<compile_context>
chip_gen: v6e
topology: v6e:2x2x1
jax: 0.10.0
libtpu: 0.0.40
codegen_flags: <defaults>
</compile_context>

<pallas_src>
import numpy as np
import jax
import jax.numpy as jnp
from jax.experimental import pallas as pl
from jax.experimental.pallas import tpu as pltpu

DIM = 2           # coordinate dim of x
H_DIM = 32        # hidden dim
N_POS = 17        # number of learned position slots
NEG_SLOPE = 0.01  # nn.LeakyReLU() default
_INV_SQRT_DIM = 1.0 / (DIM ** 0.5)


def _round_up(x, m):
    return (x + m - 1) // m * m


def _leaky(x):
    return jnp.where(x > 0, x, NEG_SLOPE * x)


def att_kernel(xk_ref, q_ref, w_ref, b_ref, out_ref):
    # xk : (B_TILE, n_k, DIM+H_DIM)   q : (B_TILE, n_q, H_DIM)
    # w  : (in_pad + 4*H_DIM, H_DIM)  packed [wu(pad); wk; wv; wd1; wd2]
    # b  : (8, H_DIM)                 rows 0..4 = [bu, bk, bv, bd1, bd2]
    # out: (B_TILE//4, n_q, 4*H_DIM)  4 batch elements packed on the lane axis
    bt, n_k, in_dim = xk_ref.shape
    _, n_q, h = q_ref.shape
    in_pad = w_ref.shape[0] - 4 * h   # 8-row-aligned start of the wk segment

    bvals = b_ref[...]                # (8, h)
    bu = bvals[0:1, :]
    bk = bvals[1:2, :]
    bv = bvals[2:3, :]
    bd1 = bvals[3:4, :]
    bd2 = bvals[4:5, :]

    wu = w_ref[0:in_dim, :]
    wk = w_ref[in_pad:in_pad + h, :]
    wv = w_ref[in_pad + h:in_pad + 2 * h, :]
    wd1 = w_ref[in_pad + 2 * h:in_pad + 3 * h, :]
    wd2 = w_ref[in_pad + 3 * h:in_pad + 4 * h, :]

    # ---- batch-independent projections as one flattened matmul each ----
    xk2 = xk_ref[...].reshape(bt * n_k, in_dim)
    up = _leaky(jnp.dot(xk2, wu, preferred_element_type=jnp.float32) + bu)      # (bt*n_k, h)
    k = (jnp.dot(up, wk, preferred_element_type=jnp.float32) + bk).reshape(bt, n_k, h)
    v = (jnp.dot(up, wv, preferred_element_type=jnp.float32) + bv).reshape(bt, n_k, h)

    # ---- batched attention (contract last dims; no k.T materialized) ----
    q = q_ref[...]                                                               # (bt, n_q, h)
    s = jnp.einsum("bqh,bkh->bqk", q, k,
                   preferred_element_type=jnp.float32) * _INV_SQRT_DIM
    s = s - jnp.max(s, axis=-1, keepdims=True)
    e = jnp.exp(s)
    # NOTE: approx=True would push this to the EUP slot (~free) at ~1e-4 rel
    # error; kept exact here so results match the f32 reference tightly.
    att = e * pl.reciprocal(jnp.sum(e, axis=-1, keepdims=True), approx=False)
    out1 = jnp.einsum("bqk,bkh->bqh", att, v,
                      preferred_element_type=jnp.float32)                        # (bt, n_q, h)

    # ---- down_dim MLP, flattened ----
    o2 = out1.reshape(bt * n_q, h)
    hid = _leaky(jnp.dot(o2, wd1, preferred_element_type=jnp.float32) + bd1)
    o = jnp.dot(hid, wd2, preferred_element_type=jnp.float32) + bd2              # (bt*n_q, h)

    # ---- pack 4 batch elements onto the lane axis -> lane-dense store ----
    og = o.reshape(bt // 4, 4, n_q, h)
    out_ref[...] = jnp.concatenate([og[:, 0], og[:, 1], og[:, 2], og[:, 3]], axis=-1)


def pack_params(params):
    """Collapse 10 weight/bias tensors into two VMEM slabs."""
    wu, bu, wk, bk, wv, bv, wd1, bd1, wd2, bd2 = [jnp.asarray(p, jnp.float32) for p in params]
    in_dim, h = wu.shape
    in_pad = _round_up(in_dim, 8)                      # keep segment starts 8-row aligned
    wu_p = jnp.pad(wu, ((0, in_pad - in_dim), (0, 0)))
    w_slab = jnp.concatenate([wu_p, wk, wv, wd1, wd2], axis=0)      # (in_pad + 4h, h)
    b_rows = jnp.concatenate([bu.reshape(1, h), bk.reshape(1, h), bv.reshape(1, h),
                              bd1.reshape(1, h), bd2.reshape(1, h)], axis=0)
    b_slab = jnp.pad(b_rows, ((0, 8 - b_rows.shape[0]), (0, 0)))    # (8, h)
    return w_slab, b_slab


def att_pallas(xk, q, w_slab, b_slab, *, b_tile=256):
    batch, n_k, in_dim = xk.shape
    _, n_q, h = q.shape

    b_tile = _round_up(max(4, min(b_tile, batch)), 4)   # multiple of 4 for lane packing
    b_pad = _round_up(batch, b_tile)
    if b_pad != batch:
        xk = jnp.pad(xk, ((0, b_pad - batch), (0, 0), (0, 0)))
        q = jnp.pad(q, ((0, b_pad - batch), (0, 0), (0, 0)))
    n_tiles = b_pad // b_tile

    flops = b_pad * (2 * n_k * in_dim * h          # up-proj
                     + 2 * 2 * n_k * h * h         # K, V
                     + 2 * n_q * n_k * h           # scores
                     + 2 * n_q * n_k * h           # att @ V
                     + 2 * 2 * n_q * h * h)        # down-MLP
    bytes_accessed = 4 * (xk.size + q.size + w_slab.size + b_slab.size + b_pad * n_q * h)
    cost = pl.CostEstimate(flops=int(flops),
                           transcendentals=int(b_pad * n_q * n_k),
                           bytes_accessed=int(bytes_accessed))

    out_packed = pl.pallas_call(
        att_kernel,
        out_shape=jax.ShapeDtypeStruct((b_pad // 4, n_q, 4 * h), jnp.float32),
        grid_spec=pltpu.PrefetchScalarGridSpec(
            num_scalar_prefetch=0,
            grid=(n_tiles,),
            in_specs=[
                pl.BlockSpec((b_tile, n_k, in_dim), lambda t: (t, 0, 0)),
                pl.BlockSpec((b_tile, n_q, h), lambda t: (t, 0, 0)),
                pl.BlockSpec(w_slab.shape, lambda t: (0, 0)),   # grid-invariant slab
                pl.BlockSpec(b_slab.shape, lambda t: (0, 0)),   # grid-invariant slab
            ],
            out_specs=pl.BlockSpec((b_tile // 4, n_q, 4 * h), lambda t: (t, 0, 0)),
        ),
        compiler_params=pltpu.CompilerParams(dimension_semantics=("parallel",)),
        cost_estimate=cost,
    )(xk, q, w_slab, b_slab)

    # unpack the 4-way lane packing back to (batch, n_q, h)
    out = (out_packed.reshape(b_pad // 4, n_q, 4, h)
           .transpose(0, 2, 1, 3)
           .reshape(b_pad, n_q, h))
    return out[:batch]


def _split_indices(m_bool):
    """Key/query slot indices per row (vectorized, device-side; matches torch
    boolean-mask ordering, i.e. increasing index)."""
    m_np = np.asarray(m_bool, dtype=bool)
    counts = m_np.sum(axis=1)
    n_k = int(counts[0])
    assert (counts == n_k).all(), "every batch row must have the same number of True mask entries"
    order = jnp.argsort(jnp.where(jnp.asarray(m_np), 0, 1), axis=1, stable=True)
    return order[:, :n_k], order[:, n_k:], n_k


def att_forward(x, m_bool, params, positions, *, b_tile=256):
    """Gather / concat glue in plain JAX, hot path in the Pallas kernel."""
    # TODO(synk): the position gather + concat could move in-kernel via
    # PrefetchScalarGridSpec index prefetch to avoid the xk/k HBM intermediates.
    batch = x.shape[0]
    k_idx, q_idx, _ = _split_indices(m_bool)
    pos = jnp.broadcast_to(positions, (batch, N_POS, H_DIM))
    k = jnp.take_along_axis(pos, k_idx[:, :, None], axis=1)          # (B, n_k, H)
    q = jnp.take_along_axis(pos, q_idx[:, :, None], axis=1)          # (B, n_q, H)
    xk = jnp.concatenate([x, k], axis=-1)                            # (B, n_k, DIM+H)
    w_slab, b_slab = pack_params(params)
    return att_pallas(xk, q, w_slab, b_slab, b_tile=b_tile)


def att_reference(x, m_bool, params, positions):
    """Pure-JAX mirror of the PyTorch forward, for verification."""
    wu, bu, wk_, bk_, wv, bv, wd1, bd1, wd2, bd2 = params
    batch = x.shape[0]
    k_idx, q_idx, _ = _split_indices(m_bool)
    pos = jnp.broadcast_to(positions, (batch, N_POS, H_DIM))
    k = jnp.take_along_axis(pos, k_idx[:, :, None], axis=1)
    q = jnp.take_along_axis(pos, q_idx[:, :, None], axis=1)
    xk = jnp.concatenate([x, k], axis=-1)
    up = _leaky(xk @ wu + bu)
    kk = up @ wk_ + bk_
    vv = up @ wv + bv
    att = jax.nn.softmax(jnp.einsum("bqh,bkh->bqk", q, kk) / (DIM ** 0.5), axis=-1)
    out1 = jnp.einsum("bqk,bkh->bqh", att, vv)
    h = _leaky(out1 @ wd1 + bd1)
    return h @ wd2 + bd2


if __name__ == "__main__":
    key = jax.random.PRNGKey(0)
    ks = jax.random.split(key, 12)

    # deterministic synthetic parameters
    positions = jax.random.normal(ks[0], (1, N_POS, H_DIM), jnp.float32)
    wu = 0.1 * jax.random.normal(ks[1], (DIM + H_DIM, H_DIM), jnp.float32)
    bu = 0.1 * jax.random.normal(ks[2], (1, H_DIM), jnp.float32)
    wk = 0.1 * jax.random.normal(ks[3], (H_DIM, H_DIM), jnp.float32)
    bk = 0.1 * jax.random.normal(ks[4], (1, H_DIM), jnp.float32)
    wv = 0.1 * jax.random.normal(ks[5], (H_DIM, H_DIM), jnp.float32)
    bv = 0.1 * jax.random.normal(ks[6], (1, H_DIM), jnp.float32)
    wd1 = 0.1 * jax.random.normal(ks[7], (H_DIM, H_DIM), jnp.float32)
    bd1 = 0.1 * jax.random.normal(ks[8], (1, H_DIM), jnp.float32)
    wd2 = 0.1 * jax.random.normal(ks[9], (H_DIM, H_DIM), jnp.float32)
    bd2 = 0.1 * jax.random.normal(ks[10], (1, H_DIM), jnp.float32)
    params = (wu, bu, wk, bk, wv, bv, wd1, bd1, wd2, bd2)

    # inputs: batch=16, 8 "key" slots per row (varied masks), 9 "query" slots
    batch, n_k = 16, 8
    m_bool = np.zeros((batch, N_POS), dtype=bool)
    for b in range(batch):
        m_bool[b, (b + np.arange(n_k)) % N_POS] = True
    x = jax.random.normal(ks[11], (batch, n_k, DIM), jnp.float32)

    # b_tile=8 -> 2 batch tiles on the grid (exercises the parallel axis)
    out = att_forward(x, m_bool, params, positions, b_tile=8)
    out = jax.block_until_ready(out)

    ref = att_reference(x, m_bool, params, positions)
    np.testing.assert_allclose(np.asarray(out), np.asarray(ref), rtol=1e-4, atol=1e-5)

    print("KERNEL_OK")
</pallas_src>

<mosaic_0001>
module attributes {stable_mosaic.version = 11 : i64} {
  func.func @att_kernel(%arg0: i32, %arg1: memref<8x8x34xf32, #tpu.memory_space<vmem>>, %arg2: memref<8x9x32xf32, #tpu.memory_space<vmem>>, %arg3: memref<168x32xf32, #tpu.memory_space<vmem>>, %arg4: memref<8x32xf32, #tpu.memory_space<vmem>>, %arg5: memref<2x9x128xf32, #tpu.memory_space<vmem>>) attributes {dimension_semantics = [#tpu.dimension_semantics<parallel>], iteration_bounds = array<i64: 2>, scalar_prefetch = 0 : i64, scratch_operands = 0 : i64, tpu.core_type = #tpu.core_type<tc>, window_params = [{transform_indices = @transform_0, window_bounds = array<i64: 8, 8, 34>}, {transform_indices = @transform_1, window_bounds = array<i64: 8, 9, 32>}, {pipeline_mode = #tpu.pipeline_mode<synchronous>, transform_indices = @transform_2, window_bounds = array<i64: 168, 32>}, {pipeline_mode = #tpu.pipeline_mode<synchronous>, transform_indices = @transform_3, window_bounds = array<i64: 8, 32>}, {transform_indices = @transform_4, window_bounds = array<i64: 2, 9, 128>}]} {
    %c0 = arith.constant 0 : index
    %c0_0 = arith.constant 0 : index
    %0 = vector.load %arg4[%c0, %c0_0] : memref<8x32xf32, #tpu.memory_space<vmem>>, vector<8x32xf32>
    %1 = vector.extract_strided_slice %0 {offsets = [0, 0], sizes = [1, 32], strides = [1, 1]} : vector<8x32xf32> to vector<1x32xf32>
    %2 = vector.extract_strided_slice %0 {offsets = [1, 0], sizes = [1, 32], strides = [1, 1]} : vector<8x32xf32> to vector<1x32xf32>
    %3 = vector.extract_strided_slice %0 {offsets = [2, 0], sizes = [1, 32], strides = [1, 1]} : vector<8x32xf32> to vector<1x32xf32>
    %4 = vector.extract_strided_slice %0 {offsets = [3, 0], sizes = [1, 32], strides = [1, 1]} : vector<8x32xf32> to vector<1x32xf32>
    %5 = vector.extract_strided_slice %0 {offsets = [4, 0], sizes = [1, 32], strides = [1, 1]} : vector<8x32xf32> to vector<1x32xf32>
    %c0_1 = arith.constant 0 : index
    %c0_2 = arith.constant 0 : index
    %6 = vector.load %arg3[%c0_1, %c0_2] : memref<168x32xf32, #tpu.memory_space<vmem>>, vector<34x32xf32>
    %c40 = arith.constant 40 : index
    %c0_3 = arith.constant 0 : index
    %7 = vector.load %arg3[%c40, %c0_3] : memref<168x32xf32, #tpu.memory_space<vmem>>, vector<32x32xf32>
    %c72 = arith.constant 72 : index
    %c0_4 = arith.constant 0 : index
    %8 = vector.load %arg3[%c72, %c0_4] : memref<168x32xf32, #tpu.memory_space<vmem>>, vector<32x32xf32>
    %c104 = arith.constant 104 : index
    %c0_5 = arith.constant 0 : index
    %9 = vector.load %arg3[%c104, %c0_5] : memref<168x32xf32, #tpu.memory_space<vmem>>, vector<32x32xf32>
    %c136 = arith.constant 136 : index
    %c0_6 = arith.constant 0 : index
    %10 = vector.load %arg3[%c136, %c0_6] : memref<168x32xf32, #tpu.memory_space<vmem>>, vector<32x32xf32>
    %c0_7 = arith.constant 0 : index
    %c0_8 = arith.constant 0 : index
    %c0_9 = arith.constant 0 : index
    %11 = vector.load %arg1[%c0_7, %c0_8, %c0_9] : memref<8x8x34xf32, #tpu.memory_space<vmem>>, vector<8x8x34xf32>
    %12 = vector.shape_cast %11 : vector<8x8x34xf32> to vector<64x34xf32>
    %cst = arith.constant dense<0.000000e+00> : vector<64x32xf32>
    %13 = tpu.matmul %12, %6, %cst {dimension_numbers = #tpu.dot_dimension_numbers<[1], [0], [0], [1], [0, 0, 1, 1], [], []>} : vector<64x34xf32>, vector<34x32xf32>, vector<64x32xf32> -> vector<64x32xf32>
    %14 = vector.broadcast %1 : vector<1x32xf32> to vector<64x32xf32>
    %15 = arith.addf %13, %14 : vector<64x32xf32>
    %cst_10 = arith.constant 0.000000e+00 : f32
    %16 = vector.broadcast %cst_10 : f32 to vector<64x32xf32>
    %17 = arith.cmpf ogt, %15, %16 : vector<64x32xf32>
    %cst_11 = arith.constant 0.00999999977 : f32
    %18 = vector.broadcast %cst_11 : f32 to vector<64x32xf32>
    %19 = arith.mulf %18, %15 : vector<64x32xf32>
    %20 = arith.select %17, %15, %19 : vector<64x32xi1>, vector<64x32xf32>
    %cst_12 = arith.constant dense<0.000000e+00> : vector<64x32xf32>
    %21 = tpu.matmul %20, %7, %cst_12 {dimension_numbers = #tpu.dot_dimension_numbers<[1], [0], [0], [1], [0, 0, 1, 1], [], []>} : vector<64x32xf32>, vector<32x32xf32>, vector<64x32xf32> -> vector<64x32xf32>
    %22 = vector.broadcast %2 : vector<1x32xf32> to vector<64x32xf32>
    %23 = arith.addf %21, %22 : vector<64x32xf32>
    %24 = vector.shape_cast %23 : vector<64x32xf32> to vector<8x8x32xf32>
    %cst_13 = arith.constant dense<0.000000e+00> : vector<64x32xf32>
    %25 = tpu.matmul %20, %8, %cst_13 {dimension_numbers = #tpu.dot_dimension_numbers<[1], [0], [0], [1], [0, 0, 1, 1], [], []>} : vector<64x32xf32>, vector<32x32xf32>, vector<64x32xf32> -> vector<64x32xf32>
    %26 = vector.broadcast %3 : vector<1x32xf32> to vector<64x32xf32>
    %27 = arith.addf %25, %26 : vector<64x32xf32>
    %28 = vector.shape_cast %27 : vector<64x32xf32> to vector<8x8x32xf32>
    %c0_14 = arith.constant 0 : index
    %c0_15 = arith.constant 0 : index
    %c0_16 = arith.constant 0 : index
    %29 = vector.load %arg2[%c0_14, %c0_15, %c0_16] : memref<8x9x32xf32, #tpu.memory_space<vmem>>, vector<8x9x32xf32>
    "tpu.trace_start"() <{level = 10 : i32, message = "bqh,bkh->bqk"}> : () -> ()
    %cst_17 = arith.constant dense<0.000000e+00> : vector<8x9x8xf32>
    %30 = tpu.matmul %29, %24, %cst_17 {dimension_numbers = #tpu.dot_dimension_numbers<[2], [2], [1], [1], [0, 0, 0, 1, 1, 1], [0], [0]>} : vector<8x9x32xf32>, vector<8x8x32xf32>, vector<8x9x8xf32> -> vector<8x9x8xf32>
    "tpu.trace_stop"() : () -> ()
    %cst_18 = arith.constant 0.707106769 : f32
    %31 = vector.broadcast %cst_18 : f32 to vector<8x9x8xf32>
    %32 = arith.mulf %30, %31 : vector<8x9x8xf32>
    %cst_19 = arith.constant dense<0xFF800000> : vector<8x9xf32>
    %33 = vector.multi_reduction <maximumf>, %32, %cst_19 [2] : vector<8x9x8xf32> to vector<8x9xf32>
    %34 = vector.shape_cast %33 : vector<8x9xf32> to vector<8x9x1xf32>
    %35 = vector.broadcast %34 : vector<8x9x1xf32> to vector<8x9x8xf32>
    %36 = arith.subf %32, %35 : vector<8x9x8xf32>
    %37 = math.exp %36 : vector<8x9x8xf32>
    %cst_20 = arith.constant dense<0.000000e+00> : vector<8x9xf32>
    %38 = vector.multi_reduction <add>, %37, %cst_20 [2] : vector<8x9x8xf32> to vector<8x9xf32>
    %39 = vector.shape_cast %38 : vector<8x9xf32> to vector<8x9x1xf32>
    %40 = tpu.reciprocal %39 : vector<8x9x1xf32> -> vector<8x9x1xf32>
    %41 = vector.broadcast %40 : vector<8x9x1xf32> to vector<8x9x8xf32>
    %42 = arith.mulf %37, %41 : vector<8x9x8xf32>
    "tpu.trace_start"() <{level = 10 : i32, message = "bqk,bkh->bqh"}> : () -> ()
    %cst_21 = arith.constant dense<0.000000e+00> : vector<8x9x32xf32>
    %43 = tpu.matmul %42, %28, %cst_21 {dimension_numbers = #tpu.dot_dimension_numbers<[2], [1], [1], [2], [0, 0, 0, 1, 1, 2], [0], [0]>} : vector<8x9x8xf32>, vector<8x8x32xf32>, vector<8x9x32xf32> -> vector<8x9x32xf32>
    "tpu.trace_stop"() : () -> ()
    %44 = vector.shape_cast %43 : vector<8x9x32xf32> to vector<72x32xf32>
    %cst_22 = arith.constant dense<0.000000e+00> : vector<72x32xf32>
    %45 = tpu.matmul %44, %9, %cst_22 {dimension_numbers = #tpu.dot_dimension_numbers<[1], [0], [0], [1], [0, 0, 1, 1], [], []>} : vector<72x32xf32>, vector<32x32xf32>, vector<72x32xf32> -> vector<72x32xf32>
    %46 = vector.broadcast %4 : vector<1x32xf32> to vector<72x32xf32>
    %47 = arith.addf %45, %46 : vector<72x32xf32>
    %cst_23 = arith.constant 0.000000e+00 : f32
    %48 = vector.broadcast %cst_23 : f32 to vector<72x32xf32>
    %49 = arith.cmpf ogt, %47, %48 : vector<72x32xf32>
    %cst_24 = arith.constant 0.00999999977 : f32
    %50 = vector.broadcast %cst_24 : f32 to vector<72x32xf32>
    %51 = arith.mulf %50, %47 : vector<72x32xf32>
    %52 = arith.select %49, %47, %51 : vector<72x32xi1>, vector<72x32xf32>
    %cst_25 = arith.constant dense<0.000000e+00> : vector<72x32xf32>
    %53 = tpu.matmul %52, %10, %cst_25 {dimension_numbers = #tpu.dot_dimension_numbers<[1], [0], [0], [1], [0, 0, 1, 1], [], []>} : vector<72x32xf32>, vector<32x32xf32>, vector<72x32xf32> -> vector<72x32xf32>
    %54 = vector.broadcast %5 : vector<1x32xf32> to vector<72x32xf32>
    %55 = arith.addf %53, %54 : vector<72x32xf32>
    %56 = vector.shape_cast %55 : vector<72x32xf32> to vector<2x4x9x32xf32>
    %57 = vector.extract_strided_slice %56 {offsets = [0, 0, 0, 0], sizes = [2, 1, 9, 32], strides = [1, 1, 1, 1]} : vector<2x4x9x32xf32> to vector<2x1x9x32xf32>
    %58 = vector.shape_cast %57 : vector<2x1x9x32xf32> to vector<2x9x32xf32>
    %59 = vector.extract_strided_slice %56 {offsets = [0, 1, 0, 0], sizes = [2, 1, 9, 32], strides = [1, 1, 1, 1]} : vector<2x4x9x32xf32> to vector<2x1x9x32xf32>
    %60 = vector.shape_cast %59 : vector<2x1x9x32xf32> to vector<2x9x32xf32>
    %61 = vector.extract_strided_slice %56 {offsets = [0, 2, 0, 0], sizes = [2, 1, 9, 32], strides = [1, 1, 1, 1]} : vector<2x4x9x32xf32> to vector<2x1x9x32xf32>
    %62 = vector.shape_cast %61 : vector<2x1x9x32xf32> to vector<2x9x32xf32>
    %63 = vector.extract_strided_slice %56 {offsets = [0, 3, 0, 0], sizes = [2, 1, 9, 32], strides = [1, 1, 1, 1]} : vector<2x4x9x32xf32> to vector<2x1x9x32xf32>
    %64 = vector.shape_cast %63 : vector<2x1x9x32xf32> to vector<2x9x32xf32>
    %65 = tpu.concatenate %58, %60, %62, %64 in 2 : vector<2x9x32xf32>, vector<2x9x32xf32>, vector<2x9x32xf32>, vector<2x9x32xf32> -> vector<2x9x128xf32>
    %c0_26 = arith.constant 0 : index
    %c0_27 = arith.constant 0 : index
    %c0_28 = arith.constant 0 : index
    %66 = vector.load %arg5[%c0_26, %c0_27, %c0_28] : memref<2x9x128xf32, #tpu.memory_space<vmem>>, vector<2x9x128xf32>
    tpu.vector_store %arg5[%c0_26, %c0_27, %c0_28], %65 {strides = array<i32>} : memref<2x9x128xf32, #tpu.memory_space<vmem>>, vector<2x9x128xf32>,
    return
  }
  func.func @transform_0(%arg0: i32) -> (i32, i32, i32) {
    %c0_i32 = arith.constant 0 : i32
    %c0_i32_0 = arith.constant 0 : i32
    %c0_i32_1 = arith.constant 0 : i32
    return %arg0, %c0_i32, %c0_i32_0 : i32, i32, i32
  }
  func.func @transform_1(%arg0: i32) -> (i32, i32, i32) {
    %c0_i32 = arith.constant 0 : i32
    %c0_i32_0 = arith.constant 0 : i32
    %c0_i32_1 = arith.constant 0 : i32
    return %arg0, %c0_i32, %c0_i32_0 : i32, i32, i32
  }
  func.func @transform_2(%arg0: i32) -> (i32, i32) {
    %c0_i32 = arith.constant 0 : i32
    %c0_i32_0 = arith.constant 0 : i32
    %c0_i32_1 = arith.constant 0 : i32
    return %c0_i32, %c0_i32_0 : i32, i32
  }
  func.func @transform_3(%arg0: i32) -> (i32, i32) {
    %c0_i32 = arith.constant 0 : i32
    %c0_i32_0 = arith.constant 0 : i32
    %c0_i32_1 = arith.constant 0 : i32
    return %c0_i32, %c0_i32_0 : i32, i32
  }
  func.func @transform_4(%arg0: i32) -> (i32, i32, i32) {
    %c0_i32 = arith.constant 0 : i32
    %c0_i32_0 = arith.constant 0 : i32
    %c0_i32_1 = arith.constant 0 : i32
    return %arg0, %c0_i32, %c0_i32_0 : i32, i32, i32
  }
}

</mosaic_0001>

<bundles_post_ra>
// kernel: tpu_custom_call.1
= control target key start
LH: loop header
LB: loop body
LE: loop exit
PB: predicated region body
PF: predicated region fallthrough
CT: control target
= control target key end

     0   :  { %s5093_s15 = smov 0   ;;  %s6010_s0 = inlined_call_operand.vmem [shape: f32[16,8,34], index: 0, kind: input, shape index: {}]   ;;  %s6011_s1 = inlined_call_operand.vmem [shape: f32[16,9,32], index: 1, kind: input, shape index: {}]   ;;  %s6012_s2 = inlined_call_operand.vmem [shape: f32[168,32], index: 2, kind: input, shape index: {}]   ;;  %s6013_s3 = inlined_call_operand.vmem [shape: f32[8,32], index: 3, kind: input, shape index: {}]   ;;  %s6014_s4 = inlined_call_operand.vmem [shape: f32[4,9,128], index: 4, kind: output, shape index: {}]  }
   0x1 LB: > { %s4536_s16 = sadd.s32 4294967295, %s5060_s15   ;;  %p4540_p0 = scmp.ge.s32.totalorder %s5060_s15, 1  ;;  %s5060_s15 = sphi %s5093_s15, %s14_s15  }
   0x2   : > { %p175_p1 = scmp.lt.s32.totalorder %s5060_s15, 3 }
   0x4   : > { %p176_p2 = pnand %p4540_p0, %p175_p1 }
   0x5   : > { %s4541_s21 = sshll.u32 (!%p176_p2), %s4536_s16, 3  ;;  %s5065_s25 = smov (!%p176_p2), 32  }
   0x6   : > { %179 = sbr.rel (%p176_p2) target bundleno = 1741 (0x6cd), region = 36  ;;  %p209_p3 = scmp.lt.s32.totalorder (!%p176_p2), %s4541_s21, 15 }
   0x7   : > { %s4546_s28 = sshll.u32 (!%p176_p2), %s4536_s16, 1 }
   0x8   : > { %p222_p4 = scmp.lt.s32.totalorder (!%p176_p2), %s4546_s28, 3 }
   0xb   : > { %v233_v0 = vld [vmem:[%s6012_s2 + $0x20] sm:$0x3]  ;;  %vm287_vm0 = vcmask 1041408   ;;  %v232_v1 = vld [vmem:[%s6012_s2 + $0x18] sm:$0xff]  ;;  %v231_v2 = vld [vmem:[%s6012_s2 + $0x10] sm:$0xff]  ;;  %s6016_s21 = smov (!%p209_p3, %s4541_s21), 15  ;;  %v258_v18 = vlaneseq }
   0xc   : > { %4763 = vmatprep.subr.msk.mxu0 %vm287_vm0, %v233_v0  ;;  %v230_v3 = vld [vmem:[%s6012_s2 + $0x8] sm:$0xff]  ;;  %s4542_s26 = sshll.u32 %s6016_s21, 3  ;;  %vm262_vm1 = vcmask 277504   ;;  %v229_v4 = vld [vmem:[%s6012_s2] sm:$0xff]  ;;  %v236_v14 = vld [vmem:[%s6012_s2 + $0x38] sm:$0xff]  ;;  %vm424_vm2 = vcmask 261120  }
   0xd   : > { %4764 = vmatpush3.msk.msra.mxu0 %vm287_vm0, %v233_v0  ;;  %s212_s5 = scalar_lea.vmem %s6010_s0, %s4542_s26  ;;  %v237_v13 = vld [vmem:[%s6012_s2 + $0x40] sm:$0xff]  ;;  %v235_v15 = vld [vmem:[%s6012_s2 + $0x30] sm:$0xff]  ;;  %v234_v16 = vld [vmem:[%s6012_s2 + $0x28] sm:$0xff]  ;;  %v5147_v19 = vshrl.u32 %v258_v18, 7  ;;  %s4650_s27 = sshll.u32 %s6016_s21, 4  ;;  %vm1367_vm11 = vcmask 64512  }
   0xe   : > { %4765 = vmatprep.subr.mxu0 %v232_v1  ;;  %v250_v5 = vld [vmem:[%s212_s5] sm:$0xff]  ;;  %v251_v6 = vld [vmem:[%s212_s5 + $0x8] sm:$0xff]  ;;  %v252_v7 = vld [vmem:[%s212_s5 + $0x10] sm:$0xff]  ;;  %4785 = vmatprep.subr.mxu1 %v237_v13  ;;  %s5185_s30 = scalar_lea.vmem %s6011_s1, %s4650_s27  ;;  %vm1371_vm12 = vcmask 57344   ;;  %vm5063_vm13 = vmmov 0   ;;  %s5066_s26 = smov 64  }
   0xf   : > { %4766 = vmatpush3.msra.mxu0 %v232_v1  ;;  %4773 = vmatprep.mubr.msk.f32.mxu0 %vm262_vm1, %v250_v5  ;;  %v253_v8 = vld [vmem:[%s212_s5 + $0x18] sm:$0xff]  ;;  %v254_v9 = vld [vmem:[%s212_s5 + $0x20] sm:$0xff]  ;;  %v255_v10 = vld [vmem:[%s212_s5 + $0x28] sm:$0xff]  ;;  %v260_v20 = vsub.s32 0, %v5147_v19  ;;  %v422_v60 = vsub.s32 1, %v5147_v19  ;;  %s5067_s27 = smov 96  }
  0x10   : > { %4767 = vmatprep.subr.mxu0 %v231_v2  ;;  %v256_v11 = vld [vmem:[%s212_s5 + $0x30] sm:$0xff]  ;;  %v257_v12 = vld [vmem:[%s212_s5 + $0x38] sm:$0xff]  ;;  %4786 = vmatpush3.msra.mxu1 %v237_v13  ;;  %v241_v17 = vld [vmem:[%s6012_s2 + $0x60] sm:$0xff]  ;;  %s6018_s28 = smov (!%p222_p4, %s4546_s28), 3 }
  0x11   : > { %4768 = vmatpush3.msra.mxu0 %v231_v2  ;;  %4787 = vmatprep.subr.mxu1 %v236_v14  ;;  %v5153_v21 = vld [vmem:[%s6013_s3] sm:$0xff]  ;;  %v240_v37 = vld [vmem:[%s6012_s2 + $0x58] sm:$0xff]  ;;  %v239_v42 = vld [vmem:[%s6012_s2 + $0x50] sm:$0xff]  ;;  %s4651_s16 = sshll.u32 %s6018_s28, 4 }
  0x12   : > { %4769 = vmatprep.subr.mxu0 %v230_v3  ;;  %4788 = vmatpush3.msra.mxu1 %v236_v14  ;;  %v261_v22 = vrot.slane %v5153_v21, %v260_v20  ;;  %v238_v47 = vld [vmem:[%s6012_s2 + $0x48] sm:$0xff]  ;;  %v663_v58 = vld [vmem:[%s5185_s30] sm:$0xff]  ;;  %v423_v62 = vrot.slane %v5153_v21, %v422_v60  ;;  %v665_v5 = vld [vmem:[%s5185_s30 + $0x10] sm:$0xff]  ;;  %v556_v14 = vsub.s32 2, %v5147_v19  ;;  %s5985_s21 = scalar_lea.vmem %s6014_s4, %s4651_s16 }
  0x13   : > { %4770 = vmatpush3.msra.mxu0 %v230_v3  ;;  %4789 = vmatprep.subr.mxu1 %v235_v15  ;;  %v671_v59 = vld [vmem:[%s5185_s30 + $0x40] sm:$0xff]  ;;  %v672_v20 = vld [vmem:[%s5185_s30 + $0x48] sm:$0x1] }
  0x14   : > { %4771 = vmatprep.subr.mxu0 %v229_v4  ;;  %4790 = vmatpush3.msra.mxu1 %v235_v15 }
  0x15   : > { %4772 = vmatpush3.msra.mxu0 %v229_v4  ;;  %4791 = vmatprep.subr.mxu1 %v234_v16  ;;  %v664_v4 = vld [vmem:[%s5185_s30 + $0x8] sm:$0x1] }
  0x16   : > { %4774 = vmatmul.mubr.msk.f32.vlgmr.msra.gmra.mxu0 %vm262_vm1, %v251_v6  ;;  %4792 = vmatpush3.msra.mxu1 %v234_v16  ;;  %v668_v16 = vld [vmem:[%s5185_s30 + $0x28] sm:$0x1] }
  0x17   : > { %4776 = vmatprep.mubr.msk.f32.mxu0 %vm262_vm1, %v252_v7  ;;  %4805 = vmatprep.subr.mxu1 %v241_v17 }
  0x1a   : > { %4777 = vmatmul.mubr.msk.f32.gmra.mxu0 %vm262_vm1, %v253_v8 }
  0x1b   : > { %4779 = vmatprep.mubr.msk.f32.mxu0 %vm262_vm1, %v254_v9  ;;  %v666_v9 = vld [vmem:[%s5185_s30 + $0x18] sm:$0x1] }
  0x1e   : > { %4780 = vmatmul.mubr.msk.f32.gmra.mxu0 %vm262_vm1, %v255_v10 }
  0x1f   : > { %4782 = vmatprep.mubr.msk.f32.mxu0 %vm262_vm1, %v256_v11 }
  0x22   : > { %4783 = vmatmul.mubr.msk.f32.gmra.mxu0 %vm262_vm1, %v257_v12  ;;  %v667_v12 = vld [vmem:[%s5185_s30 + $0x20] sm:$0xff] }
  0x23   : > { %4827 = vmatprep.mubr.msk.f32.mxu0 %vm424_vm2, %v663_v58 }
  0xd6   : > { %v4775_v23 = vpop.f32.mrf.mxu0 }
  0xd7   : > { %v363_v24 = vadd.f32 %v4775_v23, %v261_v22  ;;  %v5214_v23 = vrot.slane %v5153_v21, %v556_v14  ;;  %v676_v21 = vld [vmem:[%s5185_s30 + $0x68] sm:$0x1] }
  0xd8   : > { %v357_v25 = vpop.f32.mrf.mxu0 }
  0xd9   : > { %v358_v26 = vadd.f32 %v357_v25, %v261_v22  ;;  %v405_v27 = vmul.f32 0.01, %v363_v24  ;;  %vm397_vm3 = vcmp.gt.f32.partialorder %v363_v24, 0.0  ;;  %v675_v25 = vld [vmem:[%s5185_s30 + $0x60] sm:$0xff] }
  0xda   : > { %v4778_v28 = vpop.f32.mrf.mxu0 }
  0xdb   : > { %v373_v29 = vadd.f32 %v4778_v28, %v261_v22  ;;  %vm396_vm4 = vcmp.gt.f32.partialorder %v358_v26, 0.0  ;;  %v404_v30 = vmul.f32 0.01, %v358_v26  ;;  %v413_v36 = vsel %vm397_vm3, %v363_v24, %v405_v27  ;;  %v669_v24 = vld [vmem:[%s5185_s30 + $0x30] sm:$0xff]  ;;  %v670_v27 = vld [vmem:[%s5185_s30 + $0x38] sm:$0x1] }
  0xdc   : > { %v367_v31 = vpop.f32.mrf.mxu0 }
  0xdd   : > { %vm399_vm5 = vcmp.gt.f32.partialorder %v373_v29, 0.0  ;;  %v407_v32 = vmul.f32 0.01, %v373_v29  ;;  %v368_v33 = vadd.f32 %v367_v31, %v261_v22  ;;  %v412_v34 = vsel %vm396_vm4, %v358_v26, %v404_v30  ;;  %v673_v31 = vld [vmem:[%s5185_s30 + $0x50] sm:$0xff] }
  0xde   : > { %v4781_v35 = vpop.f32.mrf.mxu0  ;;  %4793 = vmatprep.mubr.msk.f32.mxu1 %vm424_vm2, %v412_v34 }
  0xdf   : > { %vm398_vm6 = vcmp.gt.f32.partialorder %v368_v33, 0.0  ;;  %v406_v38 = vmul.f32 0.01, %v368_v33  ;;  %v383_v39 = vadd.f32 %v4781_v35, %v261_v22  ;;  %4794 = vmatmul.mubr.msk.f32.vlgmr.msra.gmra.mxu1 %vm424_vm2, %v413_v36  ;;  %v415_v41 = vsel %vm399_vm5, %v373_v29, %v407_v32  ;;  %v677_v35 = vld [vmem:[%s5185_s30 + $0x70] sm:$0xff] }
  0xe0   : > { %v377_v40 = vpop.f32.mrf.mxu0  ;;  %4806 = vmatpush3.msra.mxu1 %v241_v17 }
  0xe1   : > { %vm401_vm7 = vcmp.gt.f32.partialorder %v383_v39, 0.0  ;;  %v409_v43 = vmul.f32 0.01, %v383_v39  ;;  %v378_v44 = vadd.f32 %v377_v40, %v261_v22  ;;  %v414_v45 = vsel %vm398_vm6, %v368_v33, %v406_v38  ;;  %4807 = vmatprep.subr.mxu1 %v240_v37  ;;  %v674_v33 = vld [vmem:[%s5185_s30 + $0x58] sm:$0x1] }
  0xe2   : > { %v4784_v46 = vpop.f32.mrf.mxu0  ;;  %4796 = vmatprep.mubr.msk.f32.mxu1 %vm424_vm2, %v414_v45  ;;  %4808 = vmatpush3.msra.mxu1 %v240_v37  ;;  %v678_v40 = vld [vmem:[%s5185_s30 + $0x78] sm:$0x1] }
  0xe3   : > { %vm400_vm8 = vcmp.gt.f32.partialorder %v378_v44, 0.0  ;;  %v408_v48 = vmul.f32 0.01, %v378_v44  ;;  %v393_v49 = vadd.f32 %v4784_v46, %v261_v22  ;;  %4797 = vmatmul.mubr.msk.f32.gmra.mxu1 %vm424_vm2, %v415_v41  ;;  %4809 = vmatprep.subr.mxu1 %v239_v42  ;;  %v417_v51 = vsel %vm401_vm7, %v383_v39, %v409_v43 }
  0xe4   : > { %v387_v50 = vpop.f32.mrf.mxu0  ;;  %4810 = vmatpush3.msra.mxu1 %v239_v42 }
  0xe5   : > { %vm403_vm9 = vcmp.gt.f32.partialorder %v393_v49, 0.0  ;;  %v411_v52 = vmul.f32 0.01, %v393_v49  ;;  %v388_v53 = vadd.f32 %v387_v50, %v261_v22  ;;  %v416_v54 = vsel %vm400_vm8, %v378_v44, %v408_v48  ;;  %4811 = vmatprep.subr.mxu1 %v238_v47 }
  0xe6   : > { %4799 = vmatprep.mubr.msk.f32.mxu1 %vm424_vm2, %v416_v54  ;;  %4812 = vmatpush3.msra.mxu1 %v238_v47  ;;  %vm4452_vm8 = vcmask 523264  }
  0xe7   : > { %vm402_vm10 = vcmp.gt.f32.partialorder %v388_v53, 0.0  ;;  %v410_v55 = vmul.f32 0.01, %v388_v53  ;;  %4800 = vmatmul.mubr.msk.f32.gmra.mxu1 %vm424_vm2, %v417_v51  ;;  %v419_v56 = vsel %vm403_vm9, %v393_v49, %v411_v52  ;;  %vm4457_vm9 = vcmask 785408  }
  0xe9   : > { %v418_v57 = vsel %vm402_vm10, %v388_v53, %v410_v55 }
  0xea   : > { %4802 = vmatprep.mubr.msk.f32.mxu1 %vm424_vm2, %v418_v57 }
  0xeb   : > { %4803 = vmatmul.mubr.msk.f32.gmra.mxu1 %vm424_vm2, %v419_v56 }
  0xec   : > { %4813 = vmatprep.mubr.msk.f32.mxu1 %vm424_vm2, %v412_v34 }
  0xef   : > { %4814 = vmatmul.mubr.msk.f32.vlgmr.msra.gmra.mxu1 %vm424_vm2, %v413_v36 }
  0xf0   : > { %4816 = vmatprep.mubr.msk.f32.mxu1 %vm424_vm2, %v414_v45 }
  0xf3   : > { %4817 = vmatmul.mubr.msk.f32.gmra.mxu1 %vm424_vm2, %v415_v41 }
  0xf4   : > { %4819 = vmatprep.mubr.msk.f32.mxu1 %vm424_vm2, %v416_v54 }
  0xf7   : > { %4820 = vmatmul.mubr.msk.f32.gmra.mxu1 %vm424_vm2, %v417_v51 }
  0xf8   : > { %4822 = vmatprep.mubr.msk.f32.mxu1 %vm424_vm2, %v418_v57 }
  0xfb   : > { %4823 = vmatmul.mubr.msk.f32.gmra.mxu1 %vm424_vm2, %v419_v56 }
  0xfc   : > { %4847 = vmatprep.mubr.msk.f32.mxu1 %vm424_vm2, %v671_v59 }
 0x19f   : > { %v4795_v61 = vpop.f32.mrf.mxu1 }
 0x1a0   : > { %v521_v2 = vadd.f32 %v4795_v61, %v423_v62 }
 0x1a1   : > { %v515_v63 = vpop.f32.mrf.mxu1 }
 0x1a2   : > { %v516_v0 = vadd.f32 %v515_v63, %v423_v62 }
 0x1a3   : > { %v4798_v1 = vpop.f32.mrf.mxu1 }
 0x1a4   : > { %4825 = vmatprep.subr.msk.mxu0 %vm424_vm2, %v516_v0  ;;  %v531_v13 = vadd.f32 %v4798_v1, %v423_v62 }
 0x1a5   : > { %v525_v3 = vpop.f32.mrf.mxu1  ;;  %4826 = vmatpush3.xpose.msk.msra.mxu0 %vm424_vm2, %v516_v0 }
 0x1a6   : > { %4830 = vmatprep.subr.msk.mxu0 %vm424_vm2, %v521_v2  ;;  %v526_v7 = vadd.f32 %v525_v3, %v423_v62 }
 0x1a7   : > { %v4801_v6 = vpop.f32.mrf.mxu1 }
 0x1a8   : > { %4828 = vmatmul.mubr.msk.f32.vlgmr.msra.gmra.mxu0 %vm424_vm2, %v664_v4  ;;  %v541_v17 = vadd.f32 %v4801_v6, %v423_v62 }
 0x1a9   : > { %v535_v8 = vpop.f32.mrf.mxu1  ;;  %4831 = vmatpush3.xpose.msk.msra.mxu0 %vm424_vm2, %v521_v2  ;;  %4832 = vmatprep.mubr.msk.f32.mxu0 %vm424_vm2, %v665_v5 }
 0x1aa   : > { %v536_v10 = vadd.f32 %v535_v8, %v423_v62  ;;  %4835 = vmatprep.subr.msk.mxu0 %vm424_vm2, %v526_v7 }
 0x1ab   : > { %v4804_v11 = vpop.f32.mrf.mxu1 }
 0x1ac   : > { %4833 = vmatmul.mubr.msk.f32.vlgmr.msra.gmra.mxu0 %vm424_vm2, %v666_v9  ;;  %4845 = vmatprep.subr.msk.mxu1 %vm424_vm2, %v536_v10  ;;  %v551_v29 = vadd.f32 %v4804_v11, %v423_v62 }
 0x1ad   : > { %v545_v15 = vpop.f32.mrf.mxu1  ;;  %4836 = vmatpush3.xpose.msk.msra.mxu0 %vm424_vm2, %v526_v7  ;;  %4846 = vmatpush3.xpose.msk.msra.mxu1 %vm424_vm2, %v536_v10 }
 0x1ae   : > { %v546_v18 = vadd.f32 %v545_v15, %v423_v62  ;;  %4840 = vmatprep.subr.msk.mxu0 %vm424_vm2, %v531_v13  ;;  %4837 = vmatprep.mubr.msk.f32.mxu0 %vm424_vm2, %v667_v12 }
 0x1af   : > { %v4815_v22 = vpop.f32.mrf.mxu1 }
 0x1b0   : > { %4838 = vmatmul.mubr.msk.f32.vlgmr.msra.gmra.mxu0 %vm424_vm2, %v668_v16  ;;  %4855 = vmatprep.subr.msk.mxu1 %vm424_vm2, %v546_v18  ;;  %v630_v37 = vadd.f32 %v4815_v22, %v5214_v23 }
 0x1b1   : > { %v624_v26 = vpop.f32.mrf.mxu1  ;;  %4841 = vmatpush3.xpose.msk.msra.mxu0 %vm424_vm2, %v531_v13  ;;  %4848 = vmatmul.mubr.msk.f32.vlgmr.msra.gmra.mxu1 %vm424_vm2, %v672_v20 }
 0x1b2   : > { %v625_v28 = vadd.f32 %v624_v26, %v5214_v23  ;;  %4856 = vmatpush3.xpose.msk.msra.mxu1 %vm424_vm2, %v546_v18  ;;  %4850 = vmatprep.subr.msk.mxu0 %vm424_vm2, %v541_v17 }
 0x1b3   : > { %v4818_v30 = vpop.f32.mrf.mxu1  ;;  %4842 = vmatprep.mubr.msk.f32.mxu0 %vm424_vm2, %v669_v24  ;;  %4857 = vmatprep.mubr.msk.f32.mxu1 %vm424_vm2, %v675_v25 }
 0x1b4   : > { %4843 = vmatmul.mubr.msk.f32.vlgmr.msra.gmra.mxu0 %vm424_vm2, %v670_v27  ;;  %4865 = vmatprep.subr.mxu1 %v625_v28  ;;  %v5253_v43 = vadd.f32 %v4818_v30, %v5214_v23 }
 0x1b5   : > { %v634_v32 = vpop.f32.mrf.mxu1  ;;  %4851 = vmatpush3.xpose.msk.msra.mxu0 %vm424_vm2, %v541_v17  ;;  %4858 = vmatmul.mubr.msk.f32.vlgmr.msra.gmra.mxu1 %vm424_vm2, %v676_v21 }
 0x1b6   : > { %v5235_v34 = vadd.f32 %v634_v32, %v5214_v23  ;;  %4866 = vmatpush3.msra.mxu1 %v625_v28  ;;  %4852 = vmatprep.mubr.msk.f32.mxu0 %vm424_vm2, %v673_v31 }
 0x1b7   : > { %v4821_v36 = vpop.f32.mrf.mxu1  ;;  %4860 = vmatprep.subr.msk.mxu0 %vm424_vm2, %v551_v29 }
 0x1b8   : > { %v5242_v38 = vadd.f32 %v4821_v36, %v5214_v23  ;;  %4875 = vmatprep.subr.mxu1 %v5235_v34  ;;  %4853 = vmatmul.mubr.msk.f32.vlgmr.msra.gmra.mxu0 %vm424_vm2, %v674_v33 }
 0x1b9   : > { %v644_v39 = vpop.f32.mrf.mxu1  ;;  %4861 = vmatpush3.xpose.msk.msra.mxu0 %vm424_vm2, %v551_v29  ;;  %4862 = vmatprep.mubr.msk.f32.mxu0 %vm424_vm2, %v677_v35 }
 0x1ba   : > { %v5250_v41 = vadd.f32 %v644_v39, %v5214_v23  ;;  %4870 = vmatprep.subr.mxu0 %v630_v37 }
 0x1bb   : > { %v4824_v42 = vpop.f32.mrf.mxu1 }
 0x1bc   : > { %4863 = vmatmul.mubr.msk.f32.vlgmr.msra.gmra.mxu0 %vm424_vm2, %v678_v40  ;;  %v5257_v44 = vadd.f32 %v4824_v42, %v5214_v23 }
 0x1bd   : > { %4871 = vmatpush3.msra.mxu0 %v630_v37  ;;  %v5266_v52 = vpop.f32.mrf.mxu1 }
 0x1be   : > { %4880 = vmatprep.subr.mxu0 %v5253_v43 }
 0x268   : > { %v4829_v45 = vpop.f32.mrf.mxu0 }
 0x269   : > { %v5262_v49 = vmul.f32 0.70710677, %v4829_v45 }
 0x26a   : > { %v754_v46 = vpop.f32.mrf.mxu0 }
 0x26b   : > { %v5260_v47 = vmul.f32 0.70710677, %v754_v46  ;;  %v1372_v56 = vsel %vm1371_vm12, %v5262_v49, -inf }
 0x26c   : > { %v4834_v48 = vpop.f32.mrf.mxu0 }
 0x26d   : > { %v1368_v50 = vsel %vm1367_vm11, %v5260_v47, -inf  ;;  %v5270_v55 = vmul.f32 0.70710677, %v4834_v48 }
 0x26e   : > { %1369 = vmax.xlane.f32.xlu0 %v1368_v50  ;;  %v838_v51 = vpop.f32.mrf.mxu0 }
 0x26f   : > { %v5268_v53 = vmul.f32 0.70710677, %v838_v51  ;;  %v1378_v0 = vsel %vm1371_vm12, %v5270_v55, -inf }
 0x270   : > { %v4839_v54 = vpop.f32.mrf.mxu0 }
 0x271   : > { %v1375_v57 = vsel %vm1367_vm11, %v5268_v53, -inf  ;;  %v4849_v58 = vpop.f32.mrf.mxu1  ;;  %v5278_v63 = vmul.f32 0.70710677, %v4839_v54 }
 0x272   : > { %1373 = vmax.xlane.f32.xlu0 %v1372_v56  ;;  %1376 = vmax.xlane.f32.xlu1 %v1375_v57  ;;  %v922_v59 = vpop.f32.mrf.mxu0  ;;  %v5294_v11 = vmul.f32 0.70710677, %v4849_v58 }
 0x273   : > { %v5276_v60 = vmul.f32 0.70710677, %v922_v59  ;;  %v1090_v62 = vpop.f32.mrf.mxu1  ;;  %v1384_v8 = vsel %vm1371_vm12, %v5278_v63, -inf }
 0x274   : > { %v4844_v61 = vpop.f32.mrf.mxu0  ;;  %v5286_v4 = vmul.f32 0.70710677, %v1090_v62  ;;  %v1396_v20 = vsel %vm1371_vm12, %v5294_v11, -inf }
 0x275   : > { %v1381_v1 = vsel %vm1367_vm11, %v5276_v60, -inf  ;;  %v4859_v6 = vpop.f32.mrf.mxu1  ;;  %v5288_v7 = vmul.f32 0.70710677, %v4844_v61 }
 0x276   : > { %1379 = vmax.xlane.f32.xlu1 %v1378_v0  ;;  %1382 = vmax.xlane.f32.xlu0 %v1381_v1  ;;  %v1006_v2 = vpop.f32.mrf.mxu0  ;;  %v1393_v12 = vsel %vm1367_vm11, %v5286_v4, -inf  ;;  %v5310_v25 = vmul.f32 0.70710677, %v4859_v6 }
 0x277   : > { %v5284_v3 = vmul.f32 0.70710677, %v1006_v2  ;;  %v1258_v14 = vpop.f32.mrf.mxu1  ;;  %v1390_v16 = vsel %vm1371_vm12, %v5288_v7, -inf }
 0x278   : > { %v4854_v5 = vpop.f32.mrf.mxu0  ;;  %v5304_v18 = vmul.f32 0.70710677, %v1258_v14  ;;  %v1408_v29 = vsel %vm1371_vm12, %v5310_v25, -inf }
 0x279   : > { %v1387_v9 = vsel %vm1367_vm11, %v5284_v3, -inf  ;;  %v5302_v17 = vmul.f32 0.70710677, %v4854_v5 }
 0x27a   : > { %1385 = vmax.xlane.f32.xlu1 %v1384_v8  ;;  %1388 = vmax.xlane.f32.xlu0 %v1387_v9  ;;  %v1174_v10 = vpop.f32.mrf.mxu0  ;;  %v1405_v27 = vsel %vm1367_vm11, %v5304_v18, -inf }
 0x27b   : > { %v5298_v13 = vmul.f32 0.70710677, %v1174_v10  ;;  %v1402_v26 = vsel %vm1371_vm12, %v5302_v17, -inf }
 0x27c   : > { %v4864_v15 = vpop.f32.mrf.mxu0 }
 0x27d   : > { %v1399_v22 = vsel %vm1367_vm11, %v5298_v13, -inf  ;;  %v5318_v21 = vmul.f32 0.70710677, %v4864_v15 }
 0x27e   : > { %1391 = vmax.xlane.f32.xlu1 %v1390_v16  ;;  %1394 = vmax.xlane.f32.xlu0 %v1393_v12  ;;  %v1342_v24 = vpop.f32.mrf.mxu0 }
 0x27f   : > { %v5316_v28 = vmul.f32 0.70710677, %v1342_v24  ;;  %v1414_v31 = vsel %vm1371_vm12, %v5318_v21, -inf }
 0x281   : > { %v1411_v30 = vsel %vm1367_vm11, %v5316_v28, -inf }
 0x282   : > { %1397 = vmax.xlane.f32.xlu1 %v1396_v20  ;;  %1400 = vmax.xlane.f32.xlu0 %v1399_v22 }
 0x286   : > { %1403 = vmax.xlane.f32.xlu1 %v1402_v26  ;;  %1406 = vmax.xlane.f32.xlu0 %v1405_v27 }
 0x28a   : > { %1409 = vmax.xlane.f32.xlu1 %v1408_v29  ;;  %1412 = vmax.xlane.f32.xlu0 %v1411_v30 }
 0x28e   : > { %1415 = vmax.xlane.f32.xlu1 %v1414_v31 }
 0x2f7   : > { %v1370_v32 = vpop.xlane.xlu0 %1369 }
 0x2f8   : > { %v1417_v33 = vsub.f32 %v5260_v47, %v1370_v32 }
 0x2fa   : > { %v1433_v35 = vmul.f32 1.442695, %v1417_v33 }
 0x2fb   : > { %v1374_v36 = vpop.xlane.xlu0 %1373  ;;  %v1377_v37 = vpop.xlane.xlu1 %1376 }
 0x2fc   : > { %4989 = vpow2.f32 %v1433_v35  ;;  %v1418_v39 = vsub.f32 %v5262_v49, %v1374_v36  ;;  %v1419_v40 = vsub.f32 %v5268_v53, %v1377_v37 }
 0x2fe   : > { %v1435_v42 = vmul.f32 1.442695, %v1418_v39  ;;  %v1437_v45 = vmul.f32 1.442695, %v1419_v40 }
 0x2ff   : > { %v1380_v46 = vpop.xlane.xlu1 %1379  ;;  %v1383_v48 = vpop.xlane.xlu0 %1382 }
 0x300   : > { %4991 = vpow2.f32 %v1435_v42  ;;  %v1420_v50 = vsub.f32 %v5270_v55, %v1380_v46  ;;  %v1421_v51 = vsub.f32 %v5276_v60, %v1383_v48 }
 0x301   : > { %4993 = vpow2.f32 %v1437_v45 }
 0x302   : > { %v1439_v54 = vmul.f32 1.442695, %v1420_v50  ;;  %v1441_v47 = vmul.f32 1.442695, %v1421_v51 }
 0x303   : > { %v1386_v56 = vpop.xlane.xlu1 %1385  ;;  %v1389_v57 = vpop.xlane.xlu0 %1388 }
 0x304   : > { %4995 = vpow2.f32 %v1439_v54  ;;  %v1422_v58 = vsub.f32 %v5278_v63, %v1386_v56  ;;  %v1423_v49 = vsub.f32 %v5284_v3, %v1389_v57 }
 0x305   : > { %4997 = vpow2.f32 %v1441_v47 }
 0x306   : > { %v1443_v53 = vmul.f32 1.442695, %v1422_v58  ;;  %v1445_v59 = vmul.f32 1.442695, %v1423_v49 }
 0x307   : > { %v1392_v61 = vpop.xlane.xlu1 %1391  ;;  %v1395_v62 = vpop.xlane.xlu0 %1394 }
 0x308   : > { %4999 = vpow2.f32 %v1443_v53  ;;  %v1424_v55 = vsub.f32 %v5288_v7, %v1392_v61  ;;  %v1425_v60 = vsub.f32 %v5286_v4, %v1395_v62 }
 0x309   : > { %v5335_v0 = vpop.eup %4989  ;;  %5001 = vpow2.f32 %v1445_v59 }
 0x30a   : > { %v1447_v1 = vmul.f32 1.442695, %v1424_v55  ;;  %v1449_v2 = vmul.f32 1.442695, %v1425_v60  ;;  %v1465_v63 = vsel %vm1367_vm11, %v5335_v0, 0.0 }
 0x30b   : > { %v1398_v5 = vpop.xlane.xlu1 %1397  ;;  %v1401_v3 = vpop.xlane.xlu0 %1400  ;;  %1466 = vadd.xlane.f32.xlu0 %v1465_v63 }
 0x30c   : > { %5003 = vpow2.f32 %v1447_v1  ;;  %v1426_v6 = vsub.f32 %v5294_v11, %v1398_v5  ;;  %v1427_v8 = vsub.f32 %v5298_v13, %v1401_v3 }
 0x30d   : > { %v5341_v9 = vpop.eup %4991  ;;  %5005 = vpow2.f32 %v1449_v2 }
 0x30e   : > { %v5343_v4 = vpop.eup %4993  ;;  %v1451_v7 = vmul.f32 1.442695, %v1426_v6  ;;  %v1453_v10 = vmul.f32 1.442695, %v1427_v8  ;;  %v1468_v12 = vsel %vm1371_vm12, %v5341_v9, 0.0 }
 0x30f   : > { %v1404_v14 = vpop.xlane.xlu1 %1403  ;;  %v1407_v15 = vpop.xlane.xlu0 %1406  ;;  %1469 = vadd.xlane.f32.xlu1 %v1468_v12  ;;  %v1471_v16 = vsel %vm1367_vm11, %v5343_v4, 0.0 }
 0x310   : > { %5007 = vpow2.f32 %v1451_v7  ;;  %v1428_v11 = vsub.f32 %v5302_v17, %v1404_v14  ;;  %v1429_v13 = vsub.f32 %v5304_v18, %v1407_v15  ;;  %1472 = vadd.xlane.f32.xlu0 %v1471_v16 }
 0x311   : > { %v5351_v20 = vpop.eup %4995  ;;  %5009 = vpow2.f32 %v1453_v10 }
 0x312   : > { %v5353_v22 = vpop.eup %4997  ;;  %v1455_v24 = vmul.f32 1.442695, %v1428_v11  ;;  %v1457_v26 = vmul.f32 1.442695, %v1429_v13  ;;  %v1474_v27 = vsel %vm1371_vm12, %v5351_v20, 0.0 }
 0x313   : > { %v1410_v29 = vpop.xlane.xlu1 %1409  ;;  %1475 = vadd.xlane.f32.xlu1 %v1474_v27  ;;  %v1477_v30 = vsel %vm1367_vm11, %v5353_v22, 0.0  ;;  %v1413_v31 = vpop.xlane.xlu0 %1412 }
 0x314   : > { %5011 = vpow2.f32 %v1455_v24  ;;  %v1430_v17 = vsub.f32 %v5310_v25, %v1410_v29  ;;  %1478 = vadd.xlane.f32.xlu0 %v1477_v30  ;;  %v1431_v18 = vsub.f32 %v5316_v28, %v1413_v31 }
 0x315   : > { %v5361_v32 = vpop.eup %4999  ;;  %5013 = vpow2.f32 %v1457_v26 }
 0x316   : > { %v5363_v33 = vpop.eup %5001  ;;  %v1459_v35 = vmul.f32 1.442695, %v1430_v17  ;;  %v1461_v36 = vmul.f32 1.442695, %v1431_v18  ;;  %v1480_v37 = vsel %vm1371_vm12, %v5361_v32, 0.0 }
 0x317   : > { %1481 = vadd.xlane.f32.xlu1 %v1480_v37  ;;  %v1416_v39 = vpop.xlane.xlu1 %1415  ;;  %v1483_v40 = vsel %vm1367_vm11, %v5363_v33, 0.0 }
 0x318   : > { %5015 = vpow2.f32 %v1459_v35  ;;  %v1432_v25 = vsub.f32 %v5318_v21, %v1416_v39  ;;  %1484 = vadd.xlane.f32.xlu0 %v1483_v40 }
 0x319   : > { %v5370_v28 = vpop.eup %5003  ;;  %5017 = vpow2.f32 %v1461_v36 }
 0x31a   : > { %v5372_v42 = vpop.eup %5005  ;;  %v1463_v45 = vmul.f32 1.442695, %v1432_v25  ;;  %v1486_v46 = vsel %vm1371_vm12, %v5370_v28, 0.0 }
 0x31b   : > { %1487 = vadd.xlane.f32.xlu1 %v1486_v46  ;;  %v1489_v48 = vsel %vm1367_vm11, %v5372_v42, 0.0 }
 0x31c   : > { %5019 = vpow2.f32 %v1463_v45  ;;  %1490 = vadd.xlane.f32.xlu0 %v1489_v48 }
 0x31d   : > { %v5378_v50 = vpop.eup %5007 }
 0x31e   : > { %v5380_v51 = vpop.eup %5009  ;;  %v1492_v21 = vsel %vm1371_vm12, %v5378_v50, 0.0 }
 0x31f   : > { %1493 = vadd.xlane.f32.xlu1 %v1492_v21  ;;  %v1495_v54 = vsel %vm1367_vm11, %v5380_v51, 0.0  ;;  %v244_v21 = vld [vmem:[%s6012_s2 + $0x78] sm:$0xff] }
 0x320   : > { %1496 = vadd.xlane.f32.xlu0 %v1495_v54  ;;  %v243_v54 = vld [vmem:[%s6012_s2 + $0x70] sm:$0xff] }
 0x321   : > { %v5386_v47 = vpop.eup %5011 }
 0x322   : > { %v5388_v56 = vpop.eup %5013  ;;  %v1498_v57 = vsel %vm1371_vm12, %v5386_v47, 0.0 }
 0x323   : > { %1499 = vadd.xlane.f32.xlu1 %v1498_v57  ;;  %v1501_v58 = vsel %vm1367_vm11, %v5388_v56, 0.0  ;;  %v5064_v57 = vmov 1966171168  }
 0x324   : > { %1502 = vadd.xlane.f32.xlu0 %v1501_v58  ;;  %v2211_v58 = vunpack.c.l.s4 %v5064_v57 }
 0x325   : > { %v5394_v49 = vpop.eup %5015 }
 0x326   : > { %v5396_v53 = vpop.eup %5017  ;;  %v1504_v59 = vsel %vm1371_vm12, %v5394_v49, 0.0 }
 0x327   : > { %1505 = vadd.xlane.f32.xlu1 %v1504_v59  ;;  %v1507_v61 = vsel %vm1367_vm11, %v5396_v53, 0.0 }
 0x328   : > { %1508 = vadd.xlane.f32.xlu0 %v1507_v61 }
 0x329   : > { %v5402_v62 = vpop.eup %5019 }
 0x32a   : > { %v1510_v55 = vsel %vm1371_vm12, %v5402_v62, 0.0 }
 0x32b   : > { %1511 = vadd.xlane.f32.xlu1 %v1510_v55 }
 0x394   : > { %v1467_v60 = vpop.xlane.xlu0 %1466 }
 0x395   : > { %5021 = vrcp.f32 %v1467_v60 }
 0x398   : > { %v1470_v1 = vpop.xlane.xlu1 %1469 }
 0x399   : > { %5023 = vrcp.f32 %v1470_v1  ;;  %v1473_v2 = vpop.xlane.xlu0 %1472 }
 0x39a   : > { %5025 = vrcp.f32 %v1473_v2 }
 0x39c   : > { %v1476_v63 = vpop.xlane.xlu1 %1475 }
 0x39d   : > { %5027 = vrcp.f32 %v1476_v63  ;;  %v1479_v5 = vpop.xlane.xlu0 %1478 }
 0x39e   : > { %5029 = vrcp.f32 %v1479_v5 }
 0x3a0   : > { %v1482_v3 = vpop.xlane.xlu1 %1481 }
 0x3a1   : > { %5031 = vrcp.f32 %v1482_v3  ;;  %v1485_v6 = vpop.xlane.xlu0 %1484 }
 0x3a2   : > { %v5022_v8 = vpop.eup %5021  ;;  %5033 = vrcp.f32 %v1485_v6 }
 0x3a3   : > { %v1529_v7 = vmul.f32 %v5022_v8, %v5335_v0 }
 0x3a4   : > { %v1488_v10 = vpop.xlane.xlu1 %1487 }
 0x3a5   : > { %5035 = vrcp.f32 %v1488_v10  ;;  %v1491_v12 = vpop.xlane.xlu0 %1490  ;;  %4867 = vmatprep.mubr.msk.f32.mxu1 %vm1367_vm11, %v1529_v7 }
 0x3a6   : > { %v5024_v14 = vpop.eup %5023  ;;  %5037 = vrcp.f32 %v1491_v12 }
 0x3a7   : > { %v5026_v15 = vpop.eup %5025  ;;  %v1530_v16 = vmul.f32 %v5024_v14, %v5341_v9 }
 0x3a8   : > { %v1494_v11 = vpop.xlane.xlu1 %1493  ;;  %v1531_v13 = vmul.f32 %v5026_v15, %v5343_v4 }
 0x3a9   : > { %5039 = vrcp.f32 %v1494_v11  ;;  %v1497_v24 = vpop.xlane.xlu0 %1496  ;;  %4868 = vmatmul.mubr.msk.f32.vlgmr.msra.gmra.mxu1 %vm1367_vm11, %v1530_v16 }
 0x3aa   : > { %v5028_v26 = vpop.eup %5027  ;;  %5041 = vrcp.f32 %v1497_v24  ;;  %4872 = vmatprep.mubr.msk.f32.mxu0 %vm1367_vm11, %v1531_v13  ;;  %4876 = vmatpush3.msra.mxu1 %v5235_v34 }
 0x3ab   : > { %v5030_v0 = vpop.eup %5029  ;;  %4885 = vmatprep.subr.mxu1 %v5250_v41  ;;  %v1532_v27 = vmul.f32 %v5028_v26, %v5351_v20 }
 0x3ac   : > { %v1500_v29 = vpop.xlane.xlu1 %1499  ;;  %v1533_v9 = vmul.f32 %v5030_v0, %v5353_v22  ;;  %v655_v22 = vadd.f32 %v5266_v52, %v5214_v23 }
 0x3ad   : > { %5043 = vrcp.f32 %v1500_v29  ;;  %v1503_v4 = vpop.xlane.xlu0 %1502  ;;  %4873 = vmatmul.mubr.msk.f32.vlgmr.msra.gmra.mxu0 %vm1367_vm11, %v1532_v27 }
 0x3ae   : > { %v5032_v30 = vpop.eup %5031  ;;  %5045 = vrcp.f32 %v1503_v4  ;;  %4877 = vmatprep.mubr.msk.f32.mxu1 %vm1367_vm11, %v1533_v9  ;;  %4881 = vmatpush3.msra.mxu0 %v5253_v43 }
 0x3af   : > { %v5034_v31 = vpop.eup %5033  ;;  %4890 = vmatprep.subr.mxu0 %v5242_v38  ;;  %v1534_v34 = vmul.f32 %v5032_v30, %v5361_v32 }
 0x3b0   : > { %v1506_v17 = vpop.xlane.xlu1 %1505  ;;  %v1535_v20 = vmul.f32 %v5034_v31, %v5363_v33 }
 0x3b1   : > { %5047 = vrcp.f32 %v1506_v17  ;;  %v1509_v18 = vpop.xlane.xlu0 %1508  ;;  %4878 = vmatmul.mubr.msk.f32.vlgmr.msra.gmra.mxu1 %vm1367_vm11, %v1534_v34 }
 0x3b2   : > { %v5036_v35 = vpop.eup %5035  ;;  %5049 = vrcp.f32 %v1509_v18  ;;  %4882 = vmatprep.mubr.msk.f32.mxu0 %vm1367_vm11, %v1535_v20  ;;  %4886 = vmatpush3.msra.mxu1 %v5250_v41 }
 0x3b3   : > { %v5038_v43 = vpop.eup %5037  ;;  %4895 = vmatprep.subr.mxu1 %v655_v22  ;;  %v1536_v32 = vmul.f32 %v5036_v35, %v5370_v28 }
 0x3b4   : > { %v1512_v36 = vpop.xlane.xlu1 %1511  ;;  %v1537_v33 = vmul.f32 %v5038_v43, %v5372_v42 }
 0x3b5   : > { %5051 = vrcp.f32 %v1512_v36  ;;  %4883 = vmatmul.mubr.msk.f32.vlgmr.msra.gmra.mxu0 %vm1367_vm11, %v1536_v32 }
 0x3b6   : > { %v5040_v23 = vpop.eup %5039  ;;  %4887 = vmatprep.mubr.msk.f32.mxu1 %vm1367_vm11, %v1537_v33  ;;  %4891 = vmatpush3.msra.mxu0 %v5242_v38 }
 0x3b7   : > { %v5042_v52 = vpop.eup %5041  ;;  %4900 = vmatprep.subr.mxu0 %v5257_v44  ;;  %v1538_v41 = vmul.f32 %v5040_v23, %v5378_v50 }
 0x3b8   : > { %v1539_v37 = vmul.f32 %v5042_v52, %v5380_v51  ;;  %v5062_v51 = vmov 0.0  }
 0x3b9   : > { %4888 = vmatmul.mubr.msk.f32.vlgmr.msra.gmra.mxu1 %vm1367_vm11, %v1538_v41 }
 0x3ba   : > { %v5044_v39 = vpop.eup %5043  ;;  %4892 = vmatprep.mubr.msk.f32.mxu0 %vm1367_vm11, %v1539_v37  ;;  %4896 = vmatpush3.msra.mxu1 %v655_v22 }
 0x3bb   : > { %v5046_v40 = vpop.eup %5045  ;;  %v1540_v25 = vmul.f32 %v5044_v39, %v5386_v47  ;;  %4905 = vmatprep.subr.mxu1 %v5062_v51  ;;  %v242_v47 = vld [vmem:[%s6012_s2 + $0x68] sm:$0xff] }
 0x3bc   : > { %v1541_v28 = vmul.f32 %v5046_v40, %v5388_v56  ;;  %v249_v56 = vld [vmem:[%s6012_s2 + $0xa0] sm:$0xff] }
 0x3bd   : > { %4893 = vmatmul.mubr.msk.f32.vlgmr.msra.gmra.mxu0 %vm1367_vm11, %v1540_v25 }
 0x3be   : > { %v5048_v38 = vpop.eup %5047  ;;  %4897 = vmatprep.mubr.msk.f32.mxu1 %vm1367_vm11, %v1541_v28  ;;  %4901 = vmatpush3.msra.mxu0 %v5257_v44  ;;  %v245_v44 = vld [vmem:[%s6012_s2 + $0x80] sm:$0xff] }
 0x3bf   : > { %v5050_v42 = vpop.eup %5049  ;;  %v1542_v45 = vmul.f32 %v5048_v38, %v5394_v49  ;;  %4940 = vmatprep.subr.mxu0 %v5062_v51  ;;  %v2212_v49 = vunpack.c.0.s8 %v2211_v58 }
 0x3c0   : > { %v1543_v46 = vmul.f32 %v5050_v42, %v5396_v53 }
 0x3c1   : > { %4898 = vmatmul.mubr.msk.f32.vlgmr.msra.gmra.mxu1 %vm1367_vm11, %v1542_v45  ;;  %v5474_v59 = vsub.s32 %v2212_v49, %v5147_v19 }
 0x3c2   : > { %v5052_v48 = vpop.eup %5051  ;;  %4902 = vmatprep.mubr.msk.f32.mxu0 %vm1367_vm11, %v1543_v46  ;;  %4906 = vmatpush3.msra.mxu1 %v245_v44 }
 0x3c3   : > { %v1544_v50 = vmul.f32 %v5052_v48, %v5402_v62  ;;  %4907 = vmatprep.subr.mxu1 %v5062_v51  ;;  %4913 = vmatprep.mubr.msk.f32.mxu1 %vm5063_vm13, %v5062_v51 }
 0x3c4   : > { %4908 = vmatpush3.msra.mxu1 %v244_v21 }
 0x3c5   : > { %4903 = vmatmul.mubr.msk.f32.vlgmr.msra.gmra.mxu0 %vm1367_vm11, %v1544_v50  ;;  %4909 = vmatprep.subr.mxu1 %v5062_v51 }
 0x3c6   : > { %4910 = vmatpush3.msra.mxu1 %v243_v54  ;;  %4948 = vmatprep.mubr.msk.f32.mxu0 %vm5063_vm13, %v5062_v51 }
 0x3c7   : > { %4911 = vmatprep.subr.mxu1 %v5062_v51  ;;  %4941 = vmatpush3.msra.mxu0 %v249_v56 }
 0x3c8   : > { %4912 = vmatpush3.msra.mxu1 %v242_v47  ;;  %4942 = vmatprep.subr.mxu0 %v5062_v51 }
 0x469   : > { %v4869_v53 = vpop.f32.mrf.mxu1 }
 0x46a   : > { %v2264_v8 = vrot.slane %v4869_v53, %v5474_v59 }
 0x46b   : > { %v1617_v61 = vpop.f32.mrf.mxu1 }
 0x46c   : > { %v2209_v62 = vcombine.high %v1617_v61, %v1617_v61  ;;  %v2216_v55 = vrot.slane %v1617_v61, %v5474_v59  ;;  %v2271_v31 = vrot.slane %v2264_v8, %v5474_v59 }
 0x46d   : > { %v4874_v60 = vpop.f32.mrf.mxu0 }
 0x46e   : > { %v2223_v1 = vrot.slane %v2209_v62, %v5474_v59  ;;  %v2224_v2 = vcombine.high %v2216_v55, %v2216_v55  ;;  %v2232_v3 = vrot.slane %v2216_v55, %v5474_v59  ;;  %v2327_v43 = vrot.slane %v4874_v60, %v5474_v59 }
 0x46f   : > { %v1698_v63 = vpop.f32.mrf.mxu0 }
 0x470   : > { %v2225_v5 = vcombine.high %v2223_v1, %v2223_v1  ;;  %v2246_v6 = vrot.slane %v2224_v2, %v5474_v59  ;;  %v2272_v7 = vcombine.high %v1698_v63, %v1698_v63  ;;  %v2279_v10 = vrot.slane %v1698_v63, %v5474_v59 }
 0x471   : > { %v2239_v12 = vrot.slane %v2223_v1, %v5474_v59  ;;  %v4879_v26 = vpop.f32.mrf.mxu1  ;;  %v2334_v42 = vrot.slane %v2327_v43, %v5474_v59 }
 0x472   : > { %v2253_v14 = vrot.slane %v2225_v5, %v5474_v59  ;;  %v2717_v15 = vcombine.low %v2232_v3, %v2246_v6  ;;  %v4614_v16 = vcombine.high %v2232_v3, %v2246_v6  ;;  %v2286_v11 = vrot.slane %v2272_v7, %v5474_v59 }
 0x473   : > { %v2287_v13 = vcombine.high %v2279_v10, %v2279_v10  ;;  %v2295_v24 = vrot.slane %v2279_v10, %v5474_v59  ;;  %v1779_v32 = vpop.f32.mrf.mxu1  ;;  %v2390_v52 = vrot.slane %v4879_v26, %v5474_v59 }
 0x474   : > { %v2719_v0 = vcombine.low %v2239_v12, %v2253_v14  ;;  %v4615_v27 = vcombine.high %v2239_v12, %v2253_v14  ;;  %v2727_v29 = vrot.slane %v2717_v15, %v5474_v59  ;;  %v2734_v9 = vrot.slane %v4614_v16, %v5474_v59 }
 0x475   : > { %v2288_v4 = vcombine.high %v2286_v11, %v2286_v11  ;;  %v2309_v30 = vrot.slane %v2287_v13, %v5474_v59  ;;  %v2302_v34 = vrot.slane %v2286_v11, %v5474_v59  ;;  %v2317_v17 = vcombine.high %v2295_v24, %v2295_v24  ;;  %v4884_v20 = vpop.f32.mrf.mxu0 }
 0x476   : > { %v2741_v22 = vrot.slane %v2719_v0, %v5474_v59  ;;  %v2748_v18 = vrot.slane %v4615_v27, %v5474_v59  ;;  %v2749_v35 = vcombine.low %v2727_v29, %v2734_v9  ;;  %v2766_v33 = vcombine.low %v2271_v31, %v2295_v24 }
 0x477   : > { %v2316_v36 = vrot.slane %v2288_v4, %v5474_v59  ;;  %v2319_v23 = vcombine.high %v2309_v30, %v2309_v30  ;;  %v2318_v41 = vcombine.high %v2302_v34, %v2302_v34  ;;  %v2767_v37 = vcombine.low %v2309_v30, %v2317_v17  ;;  %v1860_v25 = vpop.f32.mrf.mxu0 }
 0x478   : > { %v2335_v39 = vcombine.high %v1779_v32, %v1779_v32  ;;  %v2342_v40 = vrot.slane %v1779_v32, %v5474_v59  ;;  %v2750_v28 = vcombine.low %v2741_v22, %v2748_v18  ;;  %v5498_v38 = vrot.slane %v2749_v35, %v5474_v59 }
 0x479   : > { %v4889_v45 = vpop.f32.mrf.mxu1  ;;  %v2320_v46 = vcombine.high %v2316_v36, %v2316_v36  ;;  %v2776_v48 = vrot.slane %v2766_v33, %v5474_v59  ;;  %v5503_v21 = vcombine.low %v2319_v23, %v2302_v34  ;;  %v2397_v54 = vrot.slane %v2390_v52, %v5474_v59 }
 0x47a   : > { %v2349_v50 = vrot.slane %v2335_v39, %v5474_v59  ;;  %v2350_v44 = vcombine.high %v2342_v40, %v2342_v40  ;;  %v2398_v47 = vcombine.high %v1860_v25, %v1860_v25  ;;  %v2405_v56 = vrot.slane %v1860_v25, %v5474_v59 }
 0x47b   : > { %v5507_v57 = vcombine.low %v2316_v36, %v2318_v41  ;;  %v2783_v58 = vrot.slane %v2767_v37, %v5474_v59  ;;  %v2764_v61 = vrot.slane %v2750_v28, %v5474_v59  ;;  %v2358_v62 = vrot.slane %v2342_v40, %v5474_v59  ;;  %v1941_v1 = vpop.f32.mrf.mxu1 }
 0x47c   : > { %v2351_v49 = vcombine.high %v2349_v50, %v2349_v50  ;;  %v2372_v53 = vrot.slane %v2350_v44, %v5474_v59  ;;  %v2412_v55 = vrot.slane %v2398_v47, %v5474_v59  ;;  %v2413_v60 = vcombine.high %v2405_v56, %v2405_v56 }
 0x47d   : > { %v2815_v2 = vcombine.low %v2320_v46, %v2334_v42  ;;  %v2453_v5 = vrot.slane %v4884_v20, %v5474_v59  ;;  %v2421_v3 = vrot.slane %v2405_v56, %v5474_v59  ;;  %v2365_v6 = vrot.slane %v2349_v50, %v5474_v59  ;;  %v5523_v11 = vpop.f32.mrf.mxu0 }
 0x47e   : > { %v2379_v63 = vrot.slane %v2351_v49, %v5474_v59  ;;  %v2816_v8 = vcombine.low %v2358_v62, %v2372_v53  ;;  %v2414_v7 = vcombine.high %v2412_v55, %v2412_v55  ;;  %v2516_v10 = vrot.slane %v4889_v45, %v5474_v59 }
 0x47f   : > { %v2790_v12 = vrot.slane %v5503_v21, %v5474_v59  ;;  %v2435_v14 = vrot.slane %v2413_v60, %v5474_v59  ;;  %v2461_v15 = vcombine.high %v1941_v1, %v1941_v1  ;;  %v2468_v16 = vrot.slane %v1941_v1, %v5474_v59  ;;  %v2022_v43 = vpop.f32.mrf.mxu0 }
 0x480   : > { %v4616_v13 = vcombine.high %v2358_v62, %v2372_v53  ;;  %v2818_v24 = vcombine.low %v2365_v6, %v2379_v63  ;;  %v4617_v26 = vcombine.high %v2365_v6, %v2379_v63  ;;  %v2428_v0 = vrot.slane %v2412_v55, %v5474_v59 }
 0x481   : > { %v2797_v27 = vrot.slane %v5507_v57, %v5474_v59  ;;  %v5528_v29 = vcombine.low %v2776_v48, %v2783_v58  ;;  %v2460_v9 = vrot.slane %v2453_v5, %v5474_v59  ;;  %v2443_v4 = vcombine.high %v2421_v3, %v2421_v3 }
 0x482   : > { %v2825_v30 = vrot.slane %v2815_v2, %v5474_v59  ;;  %v2832_v31 = vrot.slane %v2816_v8, %v5474_v59  ;;  %v2442_v34 = vrot.slane %v2414_v7, %v5474_v59  ;;  %v5535_v17 = vrot.slane %v2516_v10, %v5474_v59 }
 0x483   : > { %v2445_v20 = vcombine.high %v2435_v14, %v2435_v14  ;;  %v2865_v22 = vcombine.low %v2397_v54, %v2421_v3  ;;  %v2475_v18 = vrot.slane %v2461_v15, %v5474_v59  ;;  %v2476_v35 = vcombine.high %v2468_v16, %v2468_v16 }
 0x484   : > { %v5539_v32 = vrot.slane %v4616_v13, %v5474_v59  ;;  %v5542_v36 = vrot.slane %v2818_v24, %v5474_v59  ;;  %v5545_v33 = vrot.slane %v4617_v26, %v5474_v59  ;;  %v2444_v23 = vcombine.high %v2428_v0, %v2428_v0 }
 0x485   : > { %v5547_v52 = vcombine.low %v2435_v14, %v2443_v4  ;;  %v2477_v41 = vcombine.high %v2475_v18, %v2475_v18  ;;  %v2484_v37 = vrot.slane %v2468_v16, %v5474_v59  ;;  %v2498_v39 = vrot.slane %v2476_v35, %v5474_v59  ;;  %v5586_v14 = vpop.f32.mrf.mxu0 }
 0x486   : > { %v2446_v40 = vcombine.high %v2442_v34, %v2442_v34  ;;  %v2765_v25 = vcombine.low %v5498_v38, %v2764_v61  ;;  %v2524_v28 = vcombine.high %v2022_v43, %v2022_v43  ;;  %v2531_v42 = vrot.slane %v2022_v43, %v5474_v59  ;;  %v4899_v38 = vpop.f32.mrf.mxu1 }
 0x487   : > { %v5553_v45 = vcombine.low %v2445_v20, %v2428_v0  ;;  %v5556_v46 = vrot.slane %v2865_v22, %v5474_v59  ;;  %v2505_v48 = vrot.slane %v2477_v41, %v5474_v59  ;;  %v2915_v50 = vcombine.low %v2484_v37, %v2498_v39 }
 0x488   : > { %v4618_v44 = vcombine.high %v2484_v37, %v2498_v39  ;;  %4914 = vmatmul.mubr.msk.f32.vlgmr.msra.gmra.mxu1 %vm424_vm2, %v2765_v25  ;;  %v2538_v54 = vrot.slane %v2524_v28, %v5474_v59  ;;  %v2539_v47 = vcombine.high %v2531_v42, %v2531_v42  ;;  %v2547_v56 = vrot.slane %v2531_v42, %v5474_v59  ;;  %v2103_v10 = vpop.f32.mrf.mxu1 }
 0x489   : > { %v2847_v57 = vcombine.low %v2825_v30, %v2832_v31  ;;  %v2848_v58 = vcombine.low %v5539_v32, %v5542_v36  ;;  %v5564_v49 = vcombine.low %v2442_v34, %v2444_v23  ;;  %v2491_v53 = vrot.slane %v2475_v18, %v5474_v59  ;;  %4916 = vmatprep.mubr.msk.f32.mxu1 %vm5063_vm13, %v5062_v51 }
 0x48a   : > { %v2579_v61 = vrot.slane %v5523_v11, %v5474_v59  ;;  %v2540_v62 = vcombine.high %v2538_v54, %v2538_v54  ;;  %v2561_v55 = vrot.slane %v2539_v47, %v5474_v59  ;;  %v2569_v60 = vcombine.high %v2547_v56, %v2547_v56 }
 0x48b   : > { %v2888_v1 = vrot.slane %v5547_v52, %v5474_v59  ;;  %v2895_v2 = vrot.slane %v5553_v45, %v5474_v59  ;;  %v2896_v63 = vcombine.low %v5545_v33, %v5556_v46  ;;  %v5578_v5 = vcombine.low %v2446_v40, %v2460_v9 }
 0x48c   : > { %v5581_v3 = vrot.slane %v2915_v50, %v5474_v59  ;;  %v5584_v6 = vrot.slane %v4618_v44, %v5474_v59  ;;  %v2962_v8 = vcombine.low %v2491_v53, %v2505_v48  ;;  %v4619_v7 = vcombine.high %v2491_v53, %v2505_v48 }
 0x48d   : > { %v2923_v15 = vrot.slane %v5564_v49, %v5474_v59  ;;  %v2568_v16 = vrot.slane %v2540_v62, %v5474_v59  ;;  %v2642_v11 = vrot.slane %v4899_v38, %v5474_v59  ;;  %v2799_v13 = vcombine.low %v2790_v12, %v2797_v27 }
 0x48e   : > { %v2586_v24 = vrot.slane %v2579_v61, %v5474_v59  ;;  %v2554_v26 = vrot.slane %v2538_v54, %v5474_v59  ;;  %v2964_v0 = vcombine.low %v5535_v17, %v2547_v56  ;;  %v2965_v9 = vcombine.low %v2561_v55, %v2569_v60  ;;  %v2184_v17 = vpop.f32.mrf.mxu0 }
 0x48f   : > { %v2806_v4 = vrot.slane %v5528_v29, %v5474_v59  ;;  %v2813_v30 = vrot.slane %v2799_v13, %v5474_v59  ;;  %v2587_v31 = vcombine.high %v2103_v10, %v2103_v10  ;;  %v2594_v34 = vrot.slane %v2103_v10, %v5474_v59 }
 0x490   : > { %v2946_v20 = vcombine.low %v5581_v3, %v5584_v6  ;;  %v5605_v21 = vrot.slane %v2962_v8, %v5474_v59  ;;  %v5608_v12 = vrot.slane %v4619_v7, %v5474_v59  ;;  %v2571_v27 = vcombine.high %v2561_v55, %v2561_v55 }
 0x491   : > { %v2572_v22 = vcombine.high %v2568_v16, %v2568_v16  ;;  %v2814_v18 = vcombine.low %v2806_v4, %v2813_v30  ;;  %v2601_v29 = vrot.slane %v2587_v31, %v5474_v59  ;;  %v2602_v35 = vcombine.high %v2594_v34, %v2594_v34 }
 0x492   : > { %v2570_v43 = vcombine.high %v2554_v26, %v2554_v26  ;;  %v2986_v32 = vrot.slane %v2964_v0, %v5474_v59  ;;  %v2855_v36 = vrot.slane %v2847_v57, %v5474_v59  ;;  %v2862_v23 = vrot.slane %v2848_v58, %v5474_v59 }
 0x493   : > { %v2993_v52 = vrot.slane %v2965_v9, %v5474_v59  ;;  %4917 = vmatmul.mubr.msk.f32.gmra.mxu1 %vm424_vm2, %v2814_v18  ;;  %v2603_v41 = vcombine.high %v2601_v29, %v2601_v29  ;;  %v2624_v37 = vrot.slane %v2602_v35, %v5474_v59  ;;  %v2650_v39 = vcombine.high %v2184_v17, %v2184_v17 }
 0x494   : > { %v2610_v40 = vrot.slane %v2594_v34, %v5474_v59  ;;  %4919 = vmatprep.mubr.msk.f32.mxu1 %vm5063_vm13, %v5062_v51  ;;  %v2863_v25 = vcombine.low %v2855_v36, %v2862_v23  ;;  %v2657_v28 = vrot.slane %v2184_v17, %v5474_v59  ;;  %v2897_v42 = vcombine.low %v2888_v1, %v2895_v2 }
 0x495   : > { %v3011_v45 = vcombine.low %v2571_v27, %v2554_v26  ;;  %v3013_v48 = vcombine.low %v2572_v22, %v2586_v24  ;;  %v2649_v50 = vrot.slane %v2642_v11, %v5474_v59  ;;  %v2664_v44 = vrot.slane %v2650_v39, %v5474_v59 }
 0x496   : > { %v3012_v54 = vcombine.low %v2568_v16, %v2570_v43  ;;  %v2631_v47 = vrot.slane %v2603_v41, %v5474_v59  ;;  %v3014_v56 = vcombine.low %v2610_v40, %v2624_v37  ;;  %v2665_v38 = vcombine.high %v2657_v28, %v2657_v28 }
 0x497   : > { %v2705_v57 = vrot.slane %v5586_v14, %v5474_v59  ;;  %4920 = vmatmul.mubr.msk.f32.gmra.mxu1 %vm424_vm2, %v2863_v25  ;;  %v2673_v58 = vrot.slane %v2657_v28, %v5474_v59  ;;  %v2911_v53 = vrot.slane %v2897_v42, %v5474_v59  ;;  %v2930_v61 = vrot.slane %v5578_v5, %v5474_v59 }
 0x498   : > { %v2995_v62 = vcombine.low %v2986_v32, %v2993_v52  ;;  %v2617_v55 = vrot.slane %v2601_v29, %v5474_v59  ;;  %v2666_v60 = vcombine.high %v2664_v44, %v2664_v44  ;;  %v2680_v1 = vrot.slane %v2664_v44, %v5474_v59  ;;  %4922 = vmatprep.mubr.msk.f32.mxu1 %vm5063_vm13, %v5062_v51 }
 0x499   : > { %v3021_v2 = vrot.slane %v3011_v45, %v5474_v59  ;;  %v3035_v3 = vrot.slane %v3013_v48, %v5474_v59  ;;  %v2687_v6 = vrot.slane %v2665_v38, %v5474_v59  ;;  %v2904_v5 = vrot.slane %v2896_v63, %v5474_v59  ;;  %v248_v38 = vld [vmem:[%s6012_s2 + $0x98] sm:$0xff] }
 0x49a   : > { %v3042_v8 = vrot.slane %v3014_v56, %v5474_v59  ;;  %v3061_v7 = vcombine.low %v2617_v55, %v2631_v47  ;;  %v4621_v10 = vcombine.high %v2617_v55, %v2631_v47  ;;  %v2694_v14 = vrot.slane %v2666_v60, %v5474_v59  ;;  %4943 = vmatpush3.msra.mxu0 %v248_v38 }
 0x49b   : > { %v3028_v16 = vrot.slane %v3012_v54, %v5474_v59  ;;  %v3063_v11 = vcombine.low %v2649_v50, %v2673_v58  ;;  %v2912_v13 = vcombine.low %v2904_v5, %v2911_v53  ;;  %v2945_v24 = vcombine.low %v2923_v15, %v2930_v61  ;;  %4944 = vmatprep.subr.mxu0 %v5062_v51  ;;  %v5700_v61 = vld [vmem:[%s6013_s3] sm:$0xff] }
 0x49c   : > { %v4620_v26 = vcombine.high %v2610_v40, %v2624_v37  ;;  %v2712_v0 = vrot.slane %v2705_v57, %v5474_v59  ;;  %v2696_v9 = vcombine.high %v2680_v1, %v2680_v1  ;;  %v2698_v33 = vcombine.high %v2694_v14, %v2694_v14  ;;  %v247_v57 = vld [vmem:[%s6012_s2 + $0x90] sm:$0xff] }
 0x49d   : > { %v2697_v46 = vcombine.high %v2687_v6, %v2687_v6  ;;  %4923 = vmatmul.mubr.msk.f32.gmra.mxu1 %vm424_vm2, %v2912_v13  ;;  %v2953_v63 = vrot.slane %v2945_v24, %v5474_v59  ;;  %v2960_v4 = vrot.slane %v2946_v20, %v5474_v59  ;;  %v2994_v30 = vcombine.low %v5605_v21, %v5608_v12 }
 0x49e   : > { %v3044_v31 = vcombine.low %v3035_v3, %v3042_v8  ;;  %v3077_v34 = vrot.slane %v3061_v7, %v5474_v59  ;;  %v3084_v49 = vrot.slane %v4621_v10, %v5474_v59  ;;  %v2695_v15 = vcombine.high %v2673_v58, %v2673_v58  ;;  %4925 = vmatprep.mubr.msk.f32.mxu1 %vm5063_vm13, %v5062_v51  ;;  %v246_v58 = vld [vmem:[%s6012_s2 + $0x88] sm:$0xff] }
 0x49f   : > { %v3091_v27 = vrot.slane %v3063_v11, %v5474_v59  ;;  %v3112_v17 = vcombine.low %v2698_v33, %v2712_v0  ;;  %v2961_v22 = vcombine.low %v2953_v63, %v2960_v4  ;;  %v3009_v18 = vrot.slane %v2995_v62, %v5474_v59  ;;  %4945 = vmatpush3.msra.mxu0 %v247_v57 }
 0x4a0   : > { %v3070_v20 = vrot.slane %v4620_v26, %v5474_v59  ;;  %v3110_v29 = vcombine.low %v2697_v46, %v2680_v1  ;;  %v3111_v35 = vcombine.low %v2694_v14, %v2696_v9  ;;  %v3002_v21 = vrot.slane %v2994_v30, %v5474_v59  ;;  %4946 = vmatprep.subr.mxu0 %v5062_v51 }
 0x4a1   : > { %4926 = vmatmul.mubr.msk.f32.gmra.mxu1 %vm424_vm2, %v2961_v22  ;;  %v3043_v12 = vcombine.low %v3021_v2, %v3028_v16  ;;  %v3109_v32 = vcombine.low %v2687_v6, %v2695_v15  ;;  %v3093_v36 = vcombine.low %v3084_v49, %v3091_v27  ;;  %v3058_v52 = vrot.slane %v3044_v31, %v5474_v59 }
 0x4a2   : > { %v3092_v43 = vcombine.low %v3070_v20, %v3077_v34  ;;  %4928 = vmatprep.mubr.msk.f32.mxu1 %vm5063_vm13, %v5062_v51  ;;  %v3010_v23 = vcombine.low %v3002_v21, %v3009_v18  ;;  %v3140_v41 = vrot.slane %v3112_v17, %v5474_v59  ;;  %v3126_v37 = vrot.slane %v3110_v29, %v5474_v59 }
 0x4a3   : > { %v3133_v39 = vrot.slane %v3111_v35, %v5474_v59  ;;  %v3051_v40 = vrot.slane %v3043_v12, %v5474_v59  ;;  %v3119_v25 = vrot.slane %v3109_v32, %v5474_v59  ;;  %v3107_v45 = vrot.slane %v3093_v36, %v5474_v59  ;;  %4947 = vmatpush3.msra.mxu0 %v246_v58 }
 0x4a4   : > { %v3100_v42 = vrot.slane %v3092_v43, %v5474_v59  ;;  %v2715_v53 = vsub.s32 3, %v5147_v19 }
 0x4a5   : > { %4929 = vmatmul.mubr.msk.f32.gmra.mxu1 %vm424_vm2, %v3010_v23  ;;  %v3059_v28 = vcombine.low %v3051_v40, %v3058_v52  ;;  %v3142_v48 = vcombine.low %v3133_v39, %v3140_v41  ;;  %v3141_v50 = vcombine.low %v3119_v25, %v3126_v37  ;;  %v3315_v25 = vsub.s32 4, %v5147_v19 }
 0x4a6   : > { %4931 = vmatprep.mubr.msk.f32.mxu1 %vm5063_vm13, %v5062_v51  ;;  %v3108_v44 = vcombine.low %v3100_v42, %v3107_v45  ;;  %v5703_v62 = vrot.slane %v5700_v61, %v2715_v53 }
 0x4a7   : > { %v3156_v54 = vrot.slane %v3142_v48, %v5474_v59  ;;  %v3149_v47 = vrot.slane %v3141_v50, %v5474_v59 }
 0x4a9   : > { %4932 = vmatmul.mubr.msk.f32.gmra.mxu1 %vm424_vm2, %v3059_v28  ;;  %v3157_v56 = vcombine.low %v3149_v47, %v3156_v54  ;;  %v5741_v28 = vrot.slane %v5700_v61, %v3315_v25 }
 0x4aa   : > { %4934 = vmatprep.mubr.msk.f32.mxu1 %vm5063_vm13, %v5062_v51 }
 0x4ad   : > { %4935 = vmatmul.mubr.msk.f32.gmra.mxu1 %vm424_vm2, %v3108_v44 }
 0x4ae   : > { %4937 = vmatprep.mubr.msk.f32.mxu1 %vm5063_vm13, %v5062_v51 }
 0x4b1   : > { %4938 = vmatmul.mubr.msk.f32.gmra.mxu1 %vm424_vm2, %v3157_v56 }
 0x548   : > { %v3242_v55 = vpop.f32.mrf.mxu1 }
 0x549   : > { %v3243_v60 = vadd.f32 %v3242_v55, %v5703_v62 }
 0x54a   : > { %v4915_v1 = vpop.f32.mrf.mxu1 }
 0x54b   : > { %vm3286_vm14 = vcmp.gt.f32.partialorder %v3243_v60, 0.0  ;;  %v3295_v2 = vmul.f32 0.01, %v3243_v60 }
 0x54d   : > { %v3304_v3 = vsel %vm3286_vm14, %v3243_v60, %v3295_v2 }
 0x54e   : > { %4949 = vmatmul.mubr.msk.f32.vlgmr.msra.gmra.mxu0 %vm424_vm2, %v3304_v3 }
 0x54f   : > { %4951 = vmatprep.mubr.msk.f32.mxu0 %vm5063_vm13, %v5062_v51 }
 0x553   : > { %v3247_v6 = vpop.f32.mrf.mxu1 }
 0x554   : > { %v3248_v5 = vadd.f32 %v3247_v6, %v5703_v62 }
 0x555   : > { %v4918_v8 = vpop.f32.mrf.mxu1 }
 0x556   : > { %vm3287_vm15 = vcmp.gt.f32.partialorder %v3248_v5, 0.0  ;;  %v3296_v7 = vmul.f32 0.01, %v3248_v5 }
 0x557   : > { %v3252_v10 = vpop.f32.mrf.mxu1 }
 0x558   : > { %v3253_v14 = vadd.f32 %v3252_v10, %v5703_v62  ;;  %v3305_v16 = vsel %vm3287_vm15, %v3248_v5, %v3296_v7 }
 0x559   : > { %v4921_v11 = vpop.f32.mrf.mxu1  ;;  %4952 = vmatmul.mubr.msk.f32.gmra.mxu0 %vm424_vm2, %v3305_v16 }
 0x55a   : > { %vm3288_vm0 = vcmp.gt.f32.partialorder %v3253_v14, 0.0  ;;  %v3297_v13 = vmul.f32 0.01, %v3253_v14  ;;  %4954 = vmatprep.mubr.msk.f32.mxu0 %vm5063_vm13, %v5062_v51 }
 0x55c   : > { %v3306_v24 = vsel %vm3288_vm0, %v3253_v14, %v3297_v13 }
 0x55d   : > { %v3257_v26 = vpop.f32.mrf.mxu1  ;;  %4955 = vmatmul.mubr.msk.f32.gmra.mxu0 %vm424_vm2, %v3306_v24 }
 0x55e   : > { %v3258_v0 = vadd.f32 %v3257_v26, %v5703_v62  ;;  %4957 = vmatprep.mubr.msk.f32.mxu0 %vm5063_vm13, %v5062_v51 }
 0x55f   : > { %v4924_v9 = vpop.f32.mrf.mxu1 }
 0x560   : > { %vm3289_vm1 = vcmp.gt.f32.partialorder %v3258_v0, 0.0  ;;  %v3298_v33 = vmul.f32 0.01, %v3258_v0 }
 0x561   : > { %v3262_v46 = vpop.f32.mrf.mxu1 }
 0x562   : > { %v3263_v63 = vadd.f32 %v3262_v46, %v5703_v62  ;;  %v3307_v4 = vsel %vm3289_vm1, %v3258_v0, %v3298_v33 }
 0x563   : > { %v4927_v30 = vpop.f32.mrf.mxu1  ;;  %4958 = vmatmul.mubr.msk.f32.gmra.mxu0 %vm424_vm2, %v3307_v4 }
 0x564   : > { %vm3290_vm3 = vcmp.gt.f32.partialorder %v3263_v63, 0.0  ;;  %v3299_v31 = vmul.f32 0.01, %v3263_v63  ;;  %4960 = vmatprep.mubr.msk.f32.mxu0 %vm5063_vm13, %v5062_v51 }
 0x565   : > { %v3267_v34 = vpop.f32.mrf.mxu1 }
 0x566   : > { %v3268_v49 = vadd.f32 %v3267_v34, %v5703_v62  ;;  %v3308_v15 = vsel %vm3290_vm3, %v3263_v63, %v3299_v31 }
 0x567   : > { %v4930_v27 = vpop.f32.mrf.mxu1  ;;  %4961 = vmatmul.mubr.msk.f32.gmra.mxu0 %vm424_vm2, %v3308_v15 }
 0x568   : > { %vm3291_vm4 = vcmp.gt.f32.partialorder %v3268_v49, 0.0  ;;  %v3300_v17 = vmul.f32 0.01, %v3268_v49  ;;  %4963 = vmatprep.mubr.msk.f32.mxu0 %vm5063_vm13, %v5062_v51 }
 0x569   : > { %v3272_v22 = vpop.f32.mrf.mxu1 }
 0x56a   : > { %v3273_v18 = vadd.f32 %v3272_v22, %v5703_v62  ;;  %v3309_v20 = vsel %vm3291_vm4, %v3268_v49, %v3300_v17 }
 0x56b   : > { %v4933_v29 = vpop.f32.mrf.mxu1  ;;  %4964 = vmatmul.mubr.msk.f32.gmra.mxu0 %vm424_vm2, %v3309_v20 }
 0x56c   : > { %vm3292_vm5 = vcmp.gt.f32.partialorder %v3273_v18, 0.0  ;;  %v3301_v35 = vmul.f32 0.01, %v3273_v18  ;;  %4966 = vmatprep.mubr.msk.f32.mxu0 %vm5063_vm13, %v5062_v51 }
 0x56d   : > { %v3277_v21 = vpop.f32.mrf.mxu1 }
 0x56e   : > { %v3278_v12 = vadd.f32 %v3277_v21, %v5703_v62  ;;  %v3310_v43 = vsel %vm3292_vm5, %v3273_v18, %v3301_v35 }
 0x56f   : > { %v4936_v32 = vpop.f32.mrf.mxu1  ;;  %4967 = vmatmul.mubr.msk.f32.gmra.mxu0 %vm424_vm2, %v3310_v43 }
 0x570   : > { %vm3293_vm6 = vcmp.gt.f32.partialorder %v3278_v12, 0.0  ;;  %v3302_v36 = vmul.f32 0.01, %v3278_v12  ;;  %4969 = vmatprep.mubr.msk.f32.mxu0 %vm5063_vm13, %v5062_v51 }
 0x571   : > { %v3282_v23 = vpop.f32.mrf.mxu1 }
 0x572   : > { %v3283_v52 = vadd.f32 %v3282_v23, %v5703_v62  ;;  %v3311_v41 = vsel %vm3293_vm6, %v3278_v12, %v3302_v36 }
 0x573   : > { %v4939_v37 = vpop.f32.mrf.mxu1  ;;  %4970 = vmatmul.mubr.msk.f32.gmra.mxu0 %vm424_vm2, %v3311_v41 }
 0x574   : > { %vm3294_vm7 = vcmp.gt.f32.partialorder %v3283_v52, 0.0  ;;  %v3303_v39 = vmul.f32 0.01, %v3283_v52  ;;  %4972 = vmatprep.mubr.msk.f32.mxu0 %vm5063_vm13, %v5062_v51 }
 0x576   : > { %v3312_v40 = vsel %vm3294_vm7, %v3283_v52, %v3303_v39 }
 0x577   : > { %4973 = vmatmul.mubr.msk.f32.gmra.mxu0 %vm424_vm2, %v3312_v40 }
 0x60e   : > { %v3410_v42 = vpop.f32.mrf.mxu0 }
 0x60f   : > { %v5744_v45 = vadd.f32 %v3410_v42, %v5741_v28 }
 0x610   : > { %v4950_v48 = vpop.f32.mrf.mxu0 }
 0x619   : > { %v3415_v50 = vpop.f32.mrf.mxu0 }
 0x61a   : > { %v3416_v44 = vadd.f32 %v3415_v50, %v5741_v28 }
 0x61b   : > { %v4953_v54 = vpop.f32.mrf.mxu0 }
 0x61c   : > { %v3512_v47 = vcombine.high %v3416_v44, %v3416_v44  ;;  %v3519_v51 = vrot.slane %v3416_v44, %v5474_v59 }
 0x61d   : > { %v3420_v56 = vpop.f32.mrf.mxu0 }
 0x61e   : > { %v3526_v38 = vrot.slane %v3512_v47, %v5474_v59  ;;  %v3527_v57 = vcombine.high %v3519_v51, %v3519_v51  ;;  %v5750_v19 = vrot.slane %v3519_v51, %v5474_v59  ;;  %v3421_v58 = vadd.f32 %v3420_v56, %v5741_v28 }
 0x61f   : > { %v4956_v53 = vpop.f32.mrf.mxu0 }
 0x620   : > { %v3528_v61 = vcombine.high %v3526_v38, %v3526_v38  ;;  %v3542_v62 = vrot.slane %v3526_v38, %v5474_v59  ;;  %v3549_v55 = vrot.slane %v3527_v57, %v5474_v59  ;;  %v3557_v60 = vcombine.high %v5750_v19, %v5750_v19 }
 0x621   : > { %v3561_v1 = vcombine.high %v3421_v58, %v3421_v58  ;;  %v3568_v2 = vrot.slane %v3421_v58, %v5474_v59 }
 0x622   : > { %v3556_v3 = vrot.slane %v3528_v61, %v5474_v59  ;;  %v3558_v6 = vcombine.high %v3542_v62, %v3542_v62  ;;  %v3559_v5 = vcombine.high %v3549_v55, %v3549_v55  ;;  %v4034_v8 = vcombine.low %v3549_v55, %v3557_v60 }
 0x623   : > { %v3575_v7 = vrot.slane %v3561_v1, %v5474_v59  ;;  %v3576_v10 = vcombine.high %v3568_v2, %v3568_v2  ;;  %v3425_v14 = vpop.f32.mrf.mxu0  ;;  %v3584_v13 = vrot.slane %v3568_v2, %v5474_v59 }
 0x624   : > { %v4035_v16 = vcombine.low %v3559_v5, %v3542_v62  ;;  %v3560_v11 = vcombine.high %v3556_v3, %v3556_v3  ;;  %v3426_v24 = vadd.f32 %v3425_v14, %v5741_v28  ;;  %v5762_v26 = vcombine.low %v3556_v3, %v3558_v6 }
 0x625   : > { %v3577_v0 = vcombine.high %v3575_v7, %v3575_v7  ;;  %v3598_v9 = vrot.slane %v3576_v10, %v5474_v59  ;;  %v4959_v33 = vpop.f32.mrf.mxu0  ;;  %v5766_v46 = vrot.slane %v3575_v7, %v5474_v59  ;;  %v4044_v15 = vrot.slane %v4034_v8, %v5474_v59 }
 0x626   : > { %v5768_v63 = vcombine.low %v3560_v11, %v3584_v13  ;;  %v3610_v4 = vcombine.high %v3426_v24, %v3426_v24  ;;  %v3617_v30 = vrot.slane %v3426_v24, %v5474_v59  ;;  %v4051_v27 = vrot.slane %v4035_v16, %v5474_v59 }
 0x627   : > { %v5772_v31 = vrot.slane %v3577_v0, %v5474_v59  ;;  %v3430_v34 = vpop.f32.mrf.mxu0  ;;  %v4089_v49 = vrot.slane %v3598_v9, %v5474_v59  ;;  %v4644_v17 = vcombine.high %v3584_v13, %v3598_v9  ;;  %v4058_v43 = vrot.slane %v5762_v26, %v5474_v59 }
 0x628   : > { %v3624_v22 = vrot.slane %v3610_v4, %v5474_v59  ;;  %v3625_v18 = vcombine.high %v3617_v30, %v3617_v30  ;;  %v3633_v20 = vrot.slane %v3617_v30, %v5474_v59  ;;  %v4065_v29 = vrot.slane %v5768_v63, %v5474_v59 }
 0x629   : > { %v4173_v35 = vcombine.low %v5766_v46, %v5772_v31  ;;  %v3431_v21 = vadd.f32 %v3430_v34, %v5741_v28  ;;  %v4962_v12 = vpop.f32.mrf.mxu0  ;;  %v4645_v32 = vcombine.high %v5766_v46, %v5772_v31  ;;  %v4096_v25 = vrot.slane %v4089_v49, %v5474_v59 }
 0x62a   : > { %v3626_v36 = vcombine.high %v3624_v22, %v3624_v22  ;;  %v3640_v23 = vrot.slane %v3624_v22, %v5474_v59  ;;  %v3647_v52 = vrot.slane %v3625_v18, %v5474_v59  ;;  %v3655_v41 = vcombine.high %v3633_v20, %v3633_v20 }
 0x62b   : > { %v3659_v37 = vcombine.high %v3431_v21, %v3431_v21  ;;  %v3666_v39 = vrot.slane %v3431_v21, %v5474_v59  ;;  %v3435_v40 = vpop.f32.mrf.mxu0  ;;  %4162 = vrot.lane.b32.xlu1 %v4096_v25, %s5065_s25  ;;  %v5798_v57 = vrot.slane %v4644_v17, %v5474_v59  ;;  %v4066_v61 = vcombine.low %v4044_v15, %v4051_v27 }
 0x62c   : > { %v3654_v42 = vrot.slane %v3626_v36, %v5474_v59  ;;  %v3656_v48 = vcombine.high %v3640_v23, %v3640_v23  ;;  %v3657_v50 = vcombine.high %v3647_v52, %v3647_v52  ;;  %v4175_v44 = vcombine.low %v3633_v20, %v3647_v52 }
 0x62d   : > { %v3673_v54 = vrot.slane %v3659_v37, %v5474_v59  ;;  %v3674_v47 = vcombine.high %v3666_v39, %v3666_v39  ;;  %v3682_v51 = vrot.slane %v3666_v39, %v5474_v59  ;;  %v3436_v56 = vadd.f32 %v3435_v40, %v5741_v28  ;;  %v4965_v38 = vpop.f32.mrf.mxu0 }
 0x62e   : > { %v5801_v58 = vrot.slane %v4175_v44, %v5474_v59  ;;  %v3658_v53 = vcombine.high %v3654_v42, %v3654_v42  ;;  %v5803_v62 = vcombine.low %v3657_v50, %v3640_v23  ;;  %v5808_v3 = vcombine.low %v3654_v42, %v3656_v48 }
 0x62f   : > { %v3675_v55 = vcombine.high %v3673_v54, %v3673_v54  ;;  %v5806_v60 = vrot.slane %v3674_v47, %v5474_v59  ;;  %v3704_v1 = vcombine.high %v3682_v51, %v3682_v51  ;;  %v3440_v2 = vpop.f32.mrf.mxu0  ;;  %v3708_v6 = vcombine.high %v3436_v56, %v3436_v56 }
 0x630   : > { %v3715_v5 = vrot.slane %v3436_v56, %v5474_v59  ;;  %v3441_v8 = vadd.f32 %v3440_v2, %v5741_v28  ;;  %v3689_v7 = vrot.slane %v3673_v54, %v5474_v59  ;;  %v5814_v14 = vcombine.low %v3658_v53, %v3682_v51 }
 0x631   : > { %v3703_v10 = vrot.slane %v3675_v55, %v5474_v59  ;;  %v4227_v16 = vrot.slane %v3655_v41, %v5474_v59  ;;  %v4968_v11 = vpop.f32.mrf.mxu0  ;;  %v5818_v13 = vcombine.low %v5806_v60, %v3704_v1  ;;  %v3722_v24 = vrot.slane %v3708_v6, %v5474_v59 }
 0x632   : > { %v3723_v26 = vcombine.high %v3715_v5, %v3715_v5  ;;  %v5822_v0 = vrot.slane %v3715_v5, %v5474_v59  ;;  %v3757_v63 = vcombine.high %v3441_v8, %v3441_v8  ;;  %v3764_v4 = vrot.slane %v3441_v8, %v5474_v59 }
 0x633   : > { %v3967_v9 = vcombine.low %v3689_v7, %v3703_v10  ;;  %v4642_v33 = vcombine.high %v3689_v7, %v3703_v10  ;;  %v3445_v30 = vpop.f32.mrf.mxu0  ;;  %v3724_v34 = vcombine.high %v3722_v24, %v3722_v24  ;;  %v5826_v49 = vrot.slane %v3722_v24, %v5474_v59 }
 0x634   : > { %v5829_v15 = vrot.slane %v3723_v26, %v5474_v59  ;;  %v4234_v27 = vrot.slane %v4227_v16, %v5474_v59  ;;  %v4334_v17 = vrot.slane %v5814_v14, %v5474_v59  ;;  %v5835_v22 = vrot.slane %v3757_v63, %v5474_v59 }
 0x635   : > { %v3772_v18 = vcombine.high %v3764_v4, %v3764_v4  ;;  %v4067_v20 = vcombine.low %v4058_v43, %v4065_v29  ;;  %v4971_v21 = vpop.f32.mrf.mxu0  ;;  %v5838_v12 = vrot.slane %v3967_v9, %v5474_v59  ;;  %v3752_v36 = vrot.slane %v3724_v34, %v5474_v59 }
 0x636   : > { %v3754_v23 = vcombine.high %v5826_v49, %v5826_v49  ;;  %v3969_v52 = vcombine.low %v5822_v0, %v5829_v15  ;;  %4300 = vrot.lane.b32.xlu1 %v4234_v27, %s5066_s26  ;;  %v5847_v41 = vrot.slane %v4642_v33, %v5474_v59  ;;  %v4643_v29 = vcombine.high %v5822_v0, %v5829_v15 }
 0x637   : > { %v3780_v43 = vrot.slane %v3764_v4, %v5474_v59  ;;  %v3794_v37 = vrot.slane %v3772_v18, %v5474_v59  ;;  %v3450_v39 = vpop.f32.mrf.mxu0  ;;  %v3756_v25 = vcombine.high %v3752_v36, %v3752_v36  ;;  %v3773_v42 = vcombine.high %v5835_v22, %v5835_v22 }
 0x638   : > { %v5854_v40 = vrot.slane %v3969_v52, %v5474_v59  ;;  %v5860_v48 = vrot.slane %v5835_v22, %v5474_v59  ;;  %v4074_v54 = vrot.slane %v4066_v61, %v5474_v59  ;;  %v4081_v47 = vrot.slane %v4067_v20, %v5474_v59 }
 0x639   : > { %v3802_v50 = vcombine.high %v3780_v43, %v3780_v43  ;;  %v3804_v44 = vcombine.high %v3794_v37, %v3794_v37  ;;  %v4974_v51 = vpop.f32.mrf.mxu0  ;;  %v5864_v56 = vcombine.low %v3752_v36, %v3754_v23  ;;  %v5866_v38 = vcombine.low %v3756_v25, %v3780_v43 }
 0x63a   : > { %v3446_v53 = vadd.f32 %v3445_v30, %v5741_v28  ;;  %v4189_v55 = vrot.slane %v4173_v35, %v5474_v59  ;;  %v4082_v2 = vcombine.low %v4074_v54, %v4081_v47  ;;  %v4196_v61 = vrot.slane %v4645_v32, %v5474_v59 }
 0x63b   : > { %v5873_v1 = vcombine.low %v3794_v37, %v3802_v50  ;;  %v3706_v6 = vcombine.high %v5806_v60, %v5806_v60  ;;  %v5882_v5 = vcombine.low %v3804_v44, %v5860_v48  ;;  %v3451_v46 = vadd.f32 %v3450_v39, %v5741_v28 }
 0x63c   : > { %v3806_v8 = vcombine.high %v3446_v53, %v3446_v53  ;;  %v3813_v7 = vrot.slane %v3446_v53, %v5474_v59  ;;  %v4204_v10 = vcombine.low %v5798_v57, %v4189_v55  ;;  %4160 = vrot.lane.b32.xlu0 %v4082_v2, %s5065_s25  ;;  %v4205_v35 = vcombine.low %v4196_v61, %v5801_v58 }
 0x63d   : > { %v4365_v16 = vrot.slane %v3706_v6, %v5474_v59  ;;  %v4320_v31 = vrot.slane %v5803_v62, %v5474_v59  ;;  %v3855_v9 = vcombine.high %v3451_v46, %v3451_v46  ;;  %v3862_v58 = vrot.slane %v3451_v46, %v5474_v59 }
 0x63e   : > { %v3820_v32 = vrot.slane %v3806_v8, %v5474_v59  ;;  %v3821_v60 = vcombine.high %v3813_v7, %v3813_v7  ;;  %v3829_v11 = vrot.slane %v3813_v7, %v5474_v59  ;;  %v4212_v24 = vrot.slane %v4204_v10, %v5474_v59 }
 0x63f   : > { %v4219_v57 = vrot.slane %v4205_v35, %v5474_v59  ;;  %v4372_v26 = vrot.slane %v4365_v16, %v5474_v59  ;;  %v4327_v62 = vrot.slane %v5808_v3, %v5474_v59  ;;  %v3869_v30 = vrot.slane %v3855_v9, %v5474_v59 }
 0x640   : > { %v3822_v33 = vcombine.high %v3820_v32, %v3820_v32  ;;  %v3836_v28 = vrot.slane %v3820_v32, %v5474_v59  ;;  %v3843_v63 = vrot.slane %v3821_v60, %v5474_v59  ;;  %v3870_v34 = vcombine.high %v3862_v58, %v3862_v58 }
 0x641   : > { %v4220_v4 = vcombine.low %v4212_v24, %v4219_v57  ;;  %4438 = vrot.lane.b32.xlu1 %v4372_v26, %s5067_s27  ;;  %v3878_v27 = vrot.slane %v3862_v58, %v5474_v59  ;;  %v4341_v21 = vrot.slane %v5818_v13, %v5474_v59  ;;  %v3871_v36 = vcombine.high %v3869_v30, %v3869_v30 }
 0x642   : > { %v3850_v22 = vrot.slane %v3822_v33, %v5474_v59  ;;  %v4236_v18 = vcombine.low %v3829_v11, %v3843_v63  ;;  %v4647_v20 = vcombine.high %v3829_v11, %v3843_v63  ;;  %v3885_v3 = vrot.slane %v3869_v30, %v5474_v59 }
 0x643   : > { %4298 = vrot.lane.b32.xlu0 %v4220_v4, %s5066_s26  ;;  %v3892_v23 = vrot.slane %v3870_v34, %v5474_v59  ;;  %v3900_v52 = vcombine.high %v3878_v27, %v3878_v27  ;;  %v4114_v43 = vrot.slane %v5866_v38, %v5474_v59  ;;  %v3899_v44 = vrot.slane %v3871_v36, %v5474_v59 }
 0x644   : > { %v4238_v37 = vcombine.low %v3836_v28, %v3850_v22  ;;  %v4252_v39 = vrot.slane %v4236_v18, %v5474_v59  ;;  %v3854_v25 = vcombine.high %v3850_v22, %v3850_v22  ;;  %v4259_v50 = vrot.slane %v4647_v20, %v5474_v59 }
 0x645   : > { %v3901_v13 = vcombine.high %v3885_v3, %v3885_v3  ;;  %v3902_v54 = vcombine.high %v3892_v23, %v3892_v23  ;;  %v4342_v51 = vcombine.low %v4320_v31, %v4327_v62  ;;  %v4343_v53 = vcombine.low %v4334_v17, %v4341_v21 }
 0x646   : > { %v4373_v47 = vcombine.low %v3854_v25, %v3878_v27  ;;  %v3801_v55 = vrot.slane %v3773_v42, %v5474_v59  ;;  %v4374_v2 = vcombine.low %v3892_v23, %v3900_v52  ;;  %v3852_v6 = vcombine.high %v3836_v28, %v3836_v28 }
 0x647   : > { %v4375_v38 = vcombine.low %v3902_v54, %v3885_v3  ;;  %v4376_v61 = vcombine.low %v3899_v44, %v3901_v13  ;;  %v4350_v8 = vrot.slane %v4342_v51, %v5474_v59  ;;  %v4357_v7 = vrot.slane %v4343_v53, %v5474_v59 }
 0x648   : > { %v4152_v10 = vrot.slane %v3801_v55, %v5474_v59  ;;  %v4107_v35 = vrot.slane %v5864_v56, %v5474_v59  ;;  %v4646_v16 = vcombine.high %v5860_v48, %v3801_v55  ;;  %v4290_v14 = vrot.slane %v3852_v6, %v5474_v59 }
 0x649   : > { %v4121_v17 = vrot.slane %v5873_v1, %v5474_v59  ;;  %v4128_v42 = vrot.slane %v5882_v5, %v5474_v59  ;;  %v4383_v46 = vrot.slane %v4373_v47, %v5474_v59  ;;  %v4358_v31 = vcombine.low %v4350_v8, %v4357_v7 }
 0x64a   : > { %v4159_v32 = vrot.slane %v4152_v10, %v5474_v59  ;;  %v4266_v60 = vrot.slane %v4238_v37, %v5474_v59  ;;  %v3998_v48 = vrot.slane %v4643_v29, %v5474_v59  ;;  %v4129_v56 = vcombine.low %v4107_v35, %v4114_v43 }
 0x64b   : > { %v4130_v11 = vcombine.low %v4121_v17, %v4128_v42  ;;  %v4245_v24 = vrot.slane %v4646_v16, %v5474_v59  ;;  %4436 = vrot.lane.b32.xlu0 %v4358_v31, %s5067_s27  ;;  %v4297_v1 = vrot.slane %v4290_v14, %v5474_v59  ;;  %v4390_v57 = vrot.slane %v4374_v2, %v5474_v59 }
 0x64c   : > { %4166 = vrot.lane.b32.xlu1 %v4159_v32, %s5065_s25  ;;  %v4268_v5 = vcombine.low %v4259_v50, %v4266_v60  ;;  %v3903_v58 = vcombine.high %v3899_v44, %v3899_v44  ;;  %v4397_v0 = vrot.slane %v4375_v38, %v5474_v59  ;;  %v4404_v29 = vrot.slane %v4376_v61, %v5474_v59 }
 0x64d   : > { %v4144_v26 = vrot.slane %v4130_v11, %v5474_v59  ;;  %v4267_v9 = vcombine.low %v4245_v24, %v4252_v39  ;;  %v4405_v33 = vcombine.low %v4383_v46, %v4390_v57  ;;  %v4137_v28 = vrot.slane %v4129_v56, %v5474_v59 }
 0x64e   : > { %v4282_v15 = vrot.slane %v4268_v5, %v5474_v59  ;;  %v4406_v62 = vcombine.low %v4397_v0, %v4404_v29  ;;  %v3999_v4 = vcombine.low %v5838_v12, %v5847_v41  ;;  %v4000_v30 = vcombine.low %v5854_v40, %v3998_v48 }
 0x64f   : > { %v4275_v63 = vrot.slane %v4267_v9, %v5474_v59  ;;  %v4145_v34 = vcombine.low %v4137_v28, %v4144_v26  ;;  %v4428_v22 = vrot.slane %v3903_v58, %v5474_v59  ;;  %v4413_v18 = vrot.slane %v4405_v33, %v5474_v59 }
 0x650   : > { %4304 = vrot.lane.b32.xlu1 %v4297_v1, %s5066_s26  ;;  %v4420_v20 = vrot.slane %v4406_v62, %v5474_v59  ;;  %v4007_v21 = vrot.slane %v3999_v4, %v5474_v59  ;;  %v4014_v36 = vrot.slane %v4000_v30, %v5474_v59  ;;  %v3463_v3 = vcombine.high %v5744_v45, %v5744_v45 }
 0x651   : > { %v4283_v27 = vcombine.low %v4275_v63, %v4282_v15  ;;  %v4435_v40 = vrot.slane %v4428_v22, %v5474_v59  ;;  %v3470_v52 = vrot.slane %v5744_v45, %v5474_v59  ;;  %v3959_v45 = vrot.slane %v5750_v19, %v5474_v59 }
 0x652   : > { %v4421_v12 = vcombine.low %v4413_v18, %v4420_v20  ;;  %v4015_v41 = vcombine.low %v4007_v21, %v4014_v36  ;;  %v3477_v23 = vrot.slane %v3463_v3, %v5474_v59  ;;  %v4022_v5 = vrot.slane %v5826_v49, %v5474_v59 }
 0x653   : > { %4302 = vrot.lane.b32.xlu0 %v4283_v27, %s5066_s26  ;;  %v3478_v37 = vcombine.high %v3470_v52, %v3470_v52  ;;  %v3486_v13 = vrot.slane %v3470_v52, %v5474_v59  ;;  %v3966_v61 = vrot.slane %v3959_v45, %v5474_v59 }
 0x654   : > { %4164 = vrot.lane.b32.xlu1 %v4145_v34, %s5065_s25  ;;  %v3479_v43 = vcombine.high %v3477_v23, %v3477_v23  ;;  %v3493_v25 = vrot.slane %v3477_v23, %v5474_v59  ;;  %v4029_v9 = vrot.slane %v4022_v5, %v5474_v59 }
 0x655   : > { %v3500_v50 = vrot.slane %v3478_v37, %v5474_v59 }
 0x656   : > { %v3507_v39 = vrot.slane %v3479_v43, %v5474_v59 }
 0x657   : > { %4440 = vrot.lane.b32.xlu0 %v4421_v12, %s5067_s27  ;;  %v3904_v51 = vcombine.low %v3486_v13, %v3500_v50  ;;  %v4640_v53 = vcombine.high %v3486_v13, %v3500_v50 }
 0x658   : > { %4442 = vrot.lane.b32.xlu1 %v4435_v40, %s5067_s27  ;;  %v3906_v54 = vcombine.low %v3493_v25, %v3507_v39  ;;  %v4641_v47 = vcombine.high %v3493_v25, %v3507_v39 }
 0x659   : > { %v3914_v6 = vrot.slane %v3904_v51, %v5474_v59  ;;  %v3921_v8 = vrot.slane %v4640_v53, %v5474_v59 }
 0x65a   : > { %v3928_v55 = vrot.slane %v3906_v54, %v5474_v59  ;;  %v3935_v2 = vrot.slane %v4641_v47, %v5474_v59 }
 0x65b   : > { %v3936_v17 = vcombine.low %v3914_v6, %v3921_v8 }
 0x65c   : > { %v3937_v35 = vcombine.low %v3928_v55, %v3935_v2 }
 0x65d   : > { %v3944_v31 = vrot.slane %v3936_v17, %v5474_v59 }
 0x65e   : > { %v3951_v42 = vrot.slane %v3937_v35, %v5474_v59 }
 0x660   : > { %v3952_v32 = vcombine.low %v3944_v31, %v3951_v42 }
 0x69d   : > { %v4163_v44 = vpop.permute.xlu1 %4162 }
 0x69e   : > { %v4449_v7 = vsel %vm424_vm2, %v3966_v61, %v4163_v44 }
 0x6a8   : > { %v4301_v38 = vpop.permute.xlu1 %4300 }
 0x6a9   : > { %v4454_v19 = vsel %vm4452_vm8, %v4449_v7, %v4301_v38 }
 0x6ae   : > { %v4161_v10 = vpop.permute.xlu0 %4160 }
 0x6af   : > { %v4448_v60 = vsel %vm424_vm2, %v3952_v32, %v4161_v10 }
 0x6b3   : > { %v4439_v16 = vpop.permute.xlu1 %4438 }
 0x6b4   : > { %v4459_v14 = vsel %vm4457_vm9, %v4454_v19, %v4439_v16 }
 0x6b5   : > { %4463 = vst [vmem:[%s5985_s21 + $0x8] sm:$0x1] %v4459_v14  ;;  %v4299_v46 = vpop.permute.xlu0 %4298 }
 0x6b6   : > { %v4453_v48 = vsel %vm4452_vm8, %v4448_v60, %v4299_v46 }
 0x6bd   : > { %v4437_v56 = vpop.permute.xlu0 %4436 }
 0x6be   : > { %v4167_v11 = vpop.permute.xlu1 %4166  ;;  %v4458_v24 = vsel %vm4457_vm9, %v4453_v48, %v4437_v56 }
 0x6bf   : > { %4462 = vst [vmem:[%s5985_s21] sm:$0xff] %v4458_v24  ;;  %v4451_v0 = vsel %vm424_vm2, %v4029_v9, %v4167_v11 }
 0x6c2   : > { %v4305_v1 = vpop.permute.xlu1 %4304 }
 0x6c3   : > { %v4456_v33 = vsel %vm4452_vm8, %v4451_v0, %v4305_v1 }
 0x6c5   : > { %v4303_v57 = vpop.permute.xlu0 %4302 }
 0x6c6   : > { %v4165_v26 = vpop.permute.xlu1 %4164 }
 0x6c7   : > { %v4450_v58 = vsel %vm424_vm2, %v4015_v41, %v4165_v26 }
 0x6c8   : > { %v4455_v15 = vsel %vm4452_vm8, %v4450_v58, %v4303_v57 }
 0x6c9   : > { %v4441_v29 = vpop.permute.xlu0 %4440 }
 0x6ca   : > { %v4443_v28 = vpop.permute.xlu1 %4442  ;;  %v4460_v63 = vsel %vm4457_vm9, %v4455_v15, %v4441_v29 }
 0x6cb   : > { %v4461_v62 = vsel %vm4457_vm9, %v4456_v33, %v4443_v28  ;;  %4464 = vst [vmem:[%s5985_s21 + $0x10] sm:$0xff] %v4460_v63 }
 0x6cc   : > { %4465 = vst [vmem:[%s5985_s21 + $0x18] sm:$0x1] %v4461_v62 }
 0x6cd PF: > { %s14_s15 = sadd.s32 1, %s5060_s15  }
 0x6ce   : > { %p11_p5 = scmp.ge.s32.totalorder %s14_s15, 4  }
 0x6d0   :  { %13 = sbr.rel (!%p11_p5) target bundleno = 1 (0x1), region = 69 }

</bundles_post_ra>
